<compile_context>
chip_gen: v7x
topology: tpu7x:2x2x1
jax: 0.10.0
libtpu: 0.0.40
codegen_flags: <defaults>
</compile_context>

<pallas_src>
import math
import numpy as np
import jax
import jax.numpy as jnp
from jax import lax
from jax.experimental import pallas as pl
from jax.experimental.pallas import tpu as pltpu  # noqa: F401  (TPU backend assumed)

GRAPH_HIDDEN = 32              # args.graph_hidden_size (F)
ATTN_HEAD = 4                  # args.attn_head         (H)
HEAD_DIM = GRAPH_HIDDEN // ATTN_HEAD
FFN_HIDDEN = 4 * GRAPH_HIDDEN  # 128
PROP = 2                       # args.prop
N_NODES = 8                    # nodes per graph
N_GRAPHS = 2                   # graphs batched block-diagonally (dgl.batch)
LN_EPS = 1e-5
VEC_ROWS = 8                   # sublane rows of the packed row-vector tile
NEG_INF = -1e30

NODE_TYPE = {"other": 0, "entity": 1, "root": 2}


def _layernorm(x, gamma, beta):
    mu = jnp.mean(x, axis=-1, keepdims=True)
    var = jnp.mean(jnp.square(x - mu), axis=-1, keepdims=True)
    return (x - mu) * lax.rsqrt(var + LN_EPS) * gamma + beta


def gat_stack_kernel(feat_ref, bias_ref, hmask_ref, wqkv_ref, w1_ref, w2_ref,
                     vec_ref, out_ref):
    """All PROP GAT layers, statically unrolled in a single kernel invocation."""
    F = GRAPH_HIDDEN
    R = feat_ref.shape[0]                    # total nodes across batched graphs

    x = feat_ref[...]                        # (R, F)   running node features (f32)
    bias = bias_ref[...]                     # (H*R, R) 0 on edges, -1e30 elsewhere
    hmask = hmask_ref[...]                   # (H*R, F) head-block column mask

    for l in range(PROP):                    # static unroll (PROP is tiny)
        wqkv = wqkv_ref[l]                   # (F, 3F)  bf16  [Wq*scale | Wk | Wv]
        w1 = w1_ref[l]                       # (F, 4F)  bf16
        w2 = w2_ref[l]                       # (4F, F)  bf16
        vec = vec_ref[l]                     # (VEC_ROWS, 4F) f32 packed row vectors

        b1 = vec[0:1, :]                     # (1, 4F)  FFN bias 1
        alpha = vec[1:2, :]                  # (1, 4F)  PReLU slope (per-channel)
        ln1_g = vec[2:3, :F]
        ln1_b = vec[3:4, :F]
        b2 = vec[4:5, :F]
        ln2_g = vec[5:6, :F]
        ln2_b = vec[6:7, :F]

        # ---- fused QKV projection: one (R,F)@(F,3F) matmul, bf16 in / f32 acc ----
        qkv = jnp.dot(x.astype(jnp.bfloat16), wqkv,
                      preferred_element_type=jnp.float32)           # (R, 3F)
        q = qkv[:, 0:F]                       # 1/sqrt(out_feats*num_heads) in Wq
        k = qkv[:, F:2 * F]
        v = qkv[:, 2 * F:3 * F]

        # ---- all-heads attention, heads stacked on the sublane axis ----
        # row r = h*R + dst; hmask keeps only head-h feature columns per block.
        q_st = jnp.concatenate([q] * ATTN_HEAD, axis=0) * hmask     # (H*R, F)
        s = lax.dot_general(q_st.astype(jnp.bfloat16), k.astype(jnp.bfloat16),
                            (((1,), (1,)), ((), ())),
                            preferred_element_type=jnp.float32)      # (H*R, R)
        s = s + bias                          # precomputed edge mask (one vadd)

        # edge_softmax over incoming edges (exact per-(head,dst) row softmax).
        m = jnp.max(s, axis=-1, keepdims=True)
        p = jnp.exp(s - m)                    # masked entries underflow to 0
        denom = jnp.sum(p, axis=-1, keepdims=True)
        a = p * pl.reciprocal(denom, approx=True)

        # message aggregation for all heads in one matmul + block-diagonal fold.
        o_st = jnp.dot(a.astype(jnp.bfloat16), v.astype(jnp.bfloat16),
                       preferred_element_type=jnp.float32) * hmask   # (H*R, F)
        merged = o_st[0:R]
        for h in range(1, ATTN_HEAD):         # static, sublane-aligned slices
            merged = merged + o_st[h * R:(h + 1) * R]

        rst = _layernorm(merged + x, ln1_g, ln1_b)

        # FFN: Linear(F,4F) -> PReLU(4F) -> Linear(4F,F); dropout == identity (eval).
        h1 = jnp.dot(rst.astype(jnp.bfloat16), w1,
                     preferred_element_type=jnp.float32) + b1
        h1 = jnp.where(h1 > 0, h1, alpha * h1)
        h2 = jnp.dot(h1.astype(jnp.bfloat16), w2,
                     preferred_element_type=jnp.float32) + b2

        x = _layernorm(rst + h2, ln2_g, ln2_b)

    out_ref[...] = x


def _cost_estimate(r, f, h, prop, nbytes):
    per_layer = (2 * r * f * (3 * f)          # QKV projection
                 + 2 * (h * r) * f * r        # attention scores
                 + 2 * (h * r) * r * f        # message aggregation
                 + 2 * r * f * (4 * f)        # FFN up
                 + 2 * r * (4 * f) * f)       # FFN down
    transc = prop * (h * r * r + h * r + 2 * r)   # exp + reciprocal + rsqrt
    return pl.CostEstimate(flops=prop * per_layer, transcendentals=transc,
                           bytes_accessed=nbytes)


@jax.jit
def graph_transformer_forward(feat, bias, head_mask, wqkv, w1, w2, vec):
    r, f = feat.shape
    nbytes = sum(int(np.prod(a.shape)) * a.dtype.itemsize
                 for a in (feat, bias, head_mask, wqkv, w1, w2, vec)) + r * f * 4
    return pl.pallas_call(
        gat_stack_kernel,
        out_shape=jax.ShapeDtypeStruct((r, f), jnp.float32),
        # No grid / no BlockSpecs: every operand is a single full-array VMEM
        # block (total working set < 0.25 MiB on all TPU generations); the
        # layer loop is unrolled inside the kernel body.
        input_output_aliases={0: 0},            # output aliases the feat buffer
        cost_estimate=_cost_estimate(r, f, ATTN_HEAD, PROP, nbytes),
    )(feat, bias, head_mask, wqkv, w1, w2, vec)


def init_gat_params(key):
    F, H4 = GRAPH_HIDDEN, FFN_HIDDEN
    ks = jax.random.split(key, 6)
    scale = 1.0 / math.sqrt(F)

    def lin(k, fan_in, fan_out):
        # nn.Linear applies x @ W.T; we store the (in, out) matrix directly.
        return jax.random.uniform(k, (fan_in, fan_out), jnp.float32, -scale, scale)

    return {
        "wq": lin(ks[0], F, F),
        "wk": lin(ks[1], F, F),
        "wv": lin(ks[2], F, F),
        "ln1_g": jnp.ones((1, F), jnp.float32),
        "ln1_b": jnp.zeros((1, F), jnp.float32),
        "w1": lin(ks[3], F, H4),
        "b1": jax.random.uniform(ks[4], (1, H4), jnp.float32, -scale, scale),
        "alpha": jnp.full((1, H4), 0.25, jnp.float32),   # nn.PReLU(4F) default
        "w2": lin(ks[5], H4, F),
        "b2": jnp.zeros((1, F), jnp.float32),
        "ln2_g": jnp.ones((1, F), jnp.float32),
        "ln2_b": jnp.zeros((1, F), jnp.float32),
    }


def pack_layer_params(layer_params):
    """Stack per-layer params into 4 contiguous arrays; matmul weights in bf16."""
    F = GRAPH_HIDDEN
    # PyTorch: e / sqrt(out_feats * num_heads) == 1/sqrt(GRAPH_HIDDEN); fold into Wq.
    attn_scale = 1.0 / math.sqrt(GRAPH_HIDDEN)
    wqkv, w1, w2, vec = [], [], [], []
    for p in layer_params:
        wqkv.append(jnp.concatenate([p["wq"] * attn_scale, p["wk"], p["wv"]],
                                    axis=1).astype(jnp.bfloat16))
        w1.append(p["w1"].astype(jnp.bfloat16))
        w2.append(p["w2"].astype(jnp.bfloat16))
        v = jnp.zeros((VEC_ROWS, FFN_HIDDEN), jnp.float32)
        v = v.at[0, :].set(p["b1"][0])
        v = v.at[1, :].set(p["alpha"][0])
        v = v.at[2, :F].set(p["ln1_g"][0])
        v = v.at[3, :F].set(p["ln1_b"][0])
        v = v.at[4, :F].set(p["b2"][0])
        v = v.at[5, :F].set(p["ln2_g"][0])
        v = v.at[6, :F].set(p["ln2_b"][0])
        vec.append(v)
    return {"wqkv": jnp.stack(wqkv), "w1": jnp.stack(w1),
            "w2": jnp.stack(w2), "vec": jnp.stack(vec)}


def build_attention_constants(adj):
    """Layer-invariant tensors hoisted out of the kernel (host-side, once).

    adj[dst, src] is the dense (possibly block-diagonal batched) adjacency.
    """
    r = adj.shape[0]
    hr = ATTN_HEAD * r
    adj_np = np.asarray(adj)
    bias = np.where(np.tile(adj_np, (ATTN_HEAD, 1)) > 0, 0.0, NEG_INF).astype(np.float32)
    row = np.arange(hr)[:, None]
    col = np.arange(GRAPH_HIDDEN)[None, :]
    head_mask = (row // r == col // HEAD_DIM).astype(np.float32)
    return jnp.asarray(bias), jnp.asarray(head_mask)


def graph_transformer(feat, adj, layer_params, node_types):
    packed = pack_layer_params(layer_params)
    bias, head_mask = build_attention_constants(adj)
    out = graph_transformer_forward(feat, bias, head_mask,
                                    packed["wqkv"], packed["w1"],
                                    packed["w2"], packed["vec"])
    # graph.filter_nodes / index_select: node types are static (built in-script),
    # so the data-dependent gather is resolved host-side (plain-JAX glue).
    # TODO(synk): dynamic filter_nodes on runtime node data has no static-shape
    #             Pallas equivalent; handled with static numpy indices instead.
    entity_idx = np.where(node_types == NODE_TYPE["entity"])[0]
    root_idx = np.where(node_types == NODE_TYPE["root"])[0]
    g_entity = out[jnp.asarray(entity_idx)]
    g_root = out[jnp.asarray(root_idx)]
    return g_entity, g_root


if __name__ == "__main__":
    key = jax.random.PRNGKey(0)
    k_feat, k_adj, k_params = jax.random.split(key, 3)

    R = N_GRAPHS * N_NODES
    # Node features (B*N, F): graphs batched on the sublane axis.
    feat = jax.random.normal(k_feat, (R, GRAPH_HIDDEN), jnp.float32)

    # B independent random directed graphs with guaranteed self-loops, batched
    # into one block-diagonal adjacency (== dgl.batch); adj[dst, src].
    rnd = np.asarray(jax.random.uniform(k_adj, (N_GRAPHS, N_NODES, N_NODES)))
    adj_np = np.zeros((R, R), np.float32)
    for g in range(N_GRAPHS):
        blk = (rnd[g] > 0.5).astype(np.float32)
        np.fill_diagonal(blk, 1.0)           # every node has >= 1 in-edge
        adj_np[g * N_NODES:(g + 1) * N_NODES, g * N_NODES:(g + 1) * N_NODES] = blk
    adj = jnp.asarray(adj_np)

    # Node types per graph: node 0 is root, nodes 1..4 are entities, rest other.
    node_types = np.zeros((R,), np.int32)
    for g in range(N_GRAPHS):
        node_types[g * N_NODES] = NODE_TYPE["root"]
        node_types[g * N_NODES + 1:g * N_NODES + 5] = NODE_TYPE["entity"]

    layer_params = [init_gat_params(k) for k in jax.random.split(k_params, PROP)]

    g_entity, g_root = graph_transformer(feat, adj, layer_params, node_types)
    jax.block_until_ready((g_entity, g_root))
    assert g_entity.shape == (N_GRAPHS * 4, GRAPH_HIDDEN)
    assert g_root.shape == (N_GRAPHS, GRAPH_HIDDEN)
    assert bool(jnp.all(jnp.isfinite(g_entity))) and bool(jnp.all(jnp.isfinite(g_root)))
    print("KERNEL_OK")
</pallas_src>

<mosaic_0001>
module attributes {stable_mosaic.version = 11 : i64} {
  func.func @gat_stack_kernel(%arg0: memref<16x32xf32, #tpu.memory_space<vmem>>, %arg1: memref<64x16xf32, #tpu.memory_space<vmem>>, %arg2: memref<64x32xf32, #tpu.memory_space<vmem>>, %arg3: memref<2x32x96xbf16, #tpu.memory_space<vmem>>, %arg4: memref<2x32x128xbf16, #tpu.memory_space<vmem>>, %arg5: memref<2x128x32xbf16, #tpu.memory_space<vmem>>, %arg6: memref<2x8x128xf32, #tpu.memory_space<vmem>>, %arg7: memref<16x32xf32, #tpu.memory_space<vmem>>) attributes {dimension_semantics = [], scalar_prefetch = 0 : i64, scratch_operands = 0 : i64, tpu.core_type = #tpu.core_type<tc>} {
    %c0 = arith.constant 0 : index
    %c0_0 = arith.constant 0 : index
    %0 = vector.load %arg0[%c0, %c0_0] : memref<16x32xf32, #tpu.memory_space<vmem>>, vector<16x32xf32>
    %c0_1 = arith.constant 0 : index
    %c0_2 = arith.constant 0 : index
    %1 = vector.load %arg1[%c0_1, %c0_2] : memref<64x16xf32, #tpu.memory_space<vmem>>, vector<64x16xf32>
    %c0_3 = arith.constant 0 : index
    %c0_4 = arith.constant 0 : index
    %2 = vector.load %arg2[%c0_3, %c0_4] : memref<64x32xf32, #tpu.memory_space<vmem>>, vector<64x32xf32>
    %c0_5 = arith.constant 0 : index
    %c0_6 = arith.constant 0 : index
    %c0_7 = arith.constant 0 : index
    %3 = vector.load %arg3[%c0_5, %c0_6, %c0_7] : memref<2x32x96xbf16, #tpu.memory_space<vmem>>, vector<1x32x96xbf16>
    %4 = vector.shape_cast %3 : vector<1x32x96xbf16> to vector<32x96xbf16>
    %c0_8 = arith.constant 0 : index
    %c0_9 = arith.constant 0 : index
    %c0_10 = arith.constant 0 : index
    %5 = vector.load %arg4[%c0_8, %c0_9, %c0_10] : memref<2x32x128xbf16, #tpu.memory_space<vmem>>, vector<1x32x128xbf16>
    %6 = vector.shape_cast %5 : vector<1x32x128xbf16> to vector<32x128xbf16>
    %c0_11 = arith.constant 0 : index
    %c0_12 = arith.constant 0 : index
    %c0_13 = arith.constant 0 : index
    %7 = vector.load %arg5[%c0_11, %c0_12, %c0_13] : memref<2x128x32xbf16, #tpu.memory_space<vmem>>, vector<1x128x32xbf16>
    %8 = vector.shape_cast %7 : vector<1x128x32xbf16> to vector<128x32xbf16>
    %c0_14 = arith.constant 0 : index
    %c0_15 = arith.constant 0 : index
    %c0_16 = arith.constant 0 : index
    %9 = vector.load %arg6[%c0_14, %c0_15, %c0_16] : memref<2x8x128xf32, #tpu.memory_space<vmem>>, vector<1x8x128xf32>
    %10 = vector.shape_cast %9 : vector<1x8x128xf32> to vector<8x128xf32>
    %11 = vector.extract_strided_slice %10 {offsets = [0, 0], sizes = [1, 128], strides = [1, 1]} : vector<8x128xf32> to vector<1x128xf32>
    %12 = vector.extract_strided_slice %10 {offsets = [1, 0], sizes = [1, 128], strides = [1, 1]} : vector<8x128xf32> to vector<1x128xf32>
    %13 = vector.extract_strided_slice %10 {offsets = [2, 0], sizes = [1, 32], strides = [1, 1]} : vector<8x128xf32> to vector<1x32xf32>
    %14 = vector.extract_strided_slice %10 {offsets = [3, 0], sizes = [1, 32], strides = [1, 1]} : vector<8x128xf32> to vector<1x32xf32>
    %15 = vector.extract_strided_slice %10 {offsets = [4, 0], sizes = [1, 32], strides = [1, 1]} : vector<8x128xf32> to vector<1x32xf32>
    %16 = vector.extract_strided_slice %10 {offsets = [5, 0], sizes = [1, 32], strides = [1, 1]} : vector<8x128xf32> to vector<1x32xf32>
    %17 = vector.extract_strided_slice %10 {offsets = [6, 0], sizes = [1, 32], strides = [1, 1]} : vector<8x128xf32> to vector<1x32xf32>
    %18 = arith.truncf %0 : vector<16x32xf32> to vector<16x32xbf16>
    %cst = arith.constant dense<0.000000e+00> : vector<16x96xf32>
    %19 = tpu.matmul %18, %4, %cst {dimension_numbers = #tpu.dot_dimension_numbers<[1], [0], [0], [1], [0, 0, 1, 1], [], []>} : vector<16x32xbf16>, vector<32x96xbf16>, vector<16x96xf32> -> vector<16x96xf32>
    %20 = vector.extract_strided_slice %19 {offsets = [0, 0], sizes = [16, 32], strides = [1, 1]} : vector<16x96xf32> to vector<16x32xf32>
    %21 = vector.extract_strided_slice %19 {offsets = [0, 32], sizes = [16, 32], strides = [1, 1]} : vector<16x96xf32> to vector<16x32xf32>
    %22 = vector.extract_strided_slice %19 {offsets = [0, 64], sizes = [16, 32], strides = [1, 1]} : vector<16x96xf32> to vector<16x32xf32>
    %23 = tpu.concatenate %20, %20, %20, %20 in 0 : vector<16x32xf32>, vector<16x32xf32>, vector<16x32xf32>, vector<16x32xf32> -> vector<64x32xf32>
    %24 = arith.mulf %23, %2 : vector<64x32xf32>
    %25 = arith.truncf %24 : vector<64x32xf32> to vector<64x32xbf16>
    %26 = arith.truncf %21 : vector<16x32xf32> to vector<16x32xbf16>
    %cst_17 = arith.constant dense<0.000000e+00> : vector<64x16xf32>
    %27 = tpu.matmul %25, %26, %cst_17 {dimension_numbers = #tpu.dot_dimension_numbers<[1], [1], [0], [0], [0, 0, 1, 0], [], []>} : vector<64x32xbf16>, vector<16x32xbf16>, vector<64x16xf32> -> vector<64x16xf32>
    %28 = arith.addf %27, %1 : vector<64x16xf32>
    %cst_18 = arith.constant dense<0xFF800000> : vector<64xf32>
    %29 = vector.multi_reduction <maximumf>, %28, %cst_18 [1] : vector<64x16xf32> to vector<64xf32>
    %30 = vector.shape_cast %29 : vector<64xf32> to vector<64x1xf32>
    %31 = vector.broadcast %30 : vector<64x1xf32> to vector<64x16xf32>
    %32 = arith.subf %28, %31 : vector<64x16xf32>
    %33 = math.exp %32 : vector<64x16xf32>
    %cst_19 = arith.constant dense<0.000000e+00> : vector<64xf32>
    %34 = vector.multi_reduction <add>, %33, %cst_19 [1] : vector<64x16xf32> to vector<64xf32>
    %35 = vector.shape_cast %34 : vector<64xf32> to vector<64x1xf32>
    %36 = tpu.reciprocal %35 {approx = true} : vector<64x1xf32> -> vector<64x1xf32>
    %37 = vector.broadcast %36 : vector<64x1xf32> to vector<64x16xf32>
    %38 = arith.mulf %33, %37 : vector<64x16xf32>
    %39 = arith.truncf %38 : vector<64x16xf32> to vector<64x16xbf16>
    %40 = arith.truncf %22 : vector<16x32xf32> to vector<16x32xbf16>
    %cst_20 = arith.constant dense<0.000000e+00> : vector<64x32xf32>
    %41 = tpu.matmul %39, %40, %cst_20 {dimension_numbers = #tpu.dot_dimension_numbers<[1], [0], [0], [1], [0, 0, 1, 1], [], []>} : vector<64x16xbf16>, vector<16x32xbf16>, vector<64x32xf32> -> vector<64x32xf32>
    %42 = arith.mulf %41, %2 : vector<64x32xf32>
    %43 = vector.extract_strided_slice %42 {offsets = [0, 0], sizes = [16, 32], strides = [1, 1]} : vector<64x32xf32> to vector<16x32xf32>
    %44 = vector.extract_strided_slice %42 {offsets = [16, 0], sizes = [16, 32], strides = [1, 1]} : vector<64x32xf32> to vector<16x32xf32>
    %45 = arith.addf %43, %44 : vector<16x32xf32>
    %46 = vector.extract_strided_slice %42 {offsets = [32, 0], sizes = [16, 32], strides = [1, 1]} : vector<64x32xf32> to vector<16x32xf32>
    %47 = arith.addf %45, %46 : vector<16x32xf32>
    %48 = vector.extract_strided_slice %42 {offsets = [48, 0], sizes = [16, 32], strides = [1, 1]} : vector<64x32xf32> to vector<16x32xf32>
    %49 = arith.addf %47, %48 : vector<16x32xf32>
    %50 = arith.addf %49, %0 : vector<16x32xf32>
    %cst_21 = arith.constant dense<0.000000e+00> : vector<16xf32>
    %51 = vector.multi_reduction <add>, %50, %cst_21 [1] : vector<16x32xf32> to vector<16xf32>
    %52 = vector.shape_cast %51 : vector<16xf32> to vector<16x1xf32>
    %cst_22 = arith.constant 3.200000e+01 : f32
    %53 = vector.broadcast %cst_22 : f32 to vector<16x1xf32>
    %54 = arith.divf %52, %53 : vector<16x1xf32>
    %55 = vector.broadcast %54 : vector<16x1xf32> to vector<16x32xf32>
    %56 = arith.subf %50, %55 : vector<16x32xf32>
    %57 = arith.mulf %56, %56 : vector<16x32xf32>
    %cst_23 = arith.constant dense<0.000000e+00> : vector<16xf32>
    %58 = vector.multi_reduction <add>, %57, %cst_23 [1] : vector<16x32xf32> to vector<16xf32>
    %59 = vector.shape_cast %58 : vector<16xf32> to vector<16x1xf32>
    %cst_24 = arith.constant 3.200000e+01 : f32
    %60 = vector.broadcast %cst_24 : f32 to vector<16x1xf32>
    %61 = arith.divf %59, %60 : vector<16x1xf32>
    %62 = vector.broadcast %54 : vector<16x1xf32> to vector<16x32xf32>
    %63 = arith.subf %50, %62 : vector<16x32xf32>
    %cst_25 = arith.constant 9.99999974E-6 : f32
    %64 = vector.broadcast %cst_25 : f32 to vector<16x1xf32>
    %65 = arith.addf %61, %64 : vector<16x1xf32>
    %66 = math.rsqrt %65 : vector<16x1xf32>
    %67 = vector.broadcast %66 : vector<16x1xf32> to vector<16x32xf32>
    %68 = arith.mulf %63, %67 : vector<16x32xf32>
    %69 = vector.broadcast %13 : vector<1x32xf32> to vector<16x32xf32>
    %70 = arith.mulf %68, %69 : vector<16x32xf32>
    %71 = vector.broadcast %14 : vector<1x32xf32> to vector<16x32xf32>
    %72 = arith.addf %70, %71 : vector<16x32xf32>
    %73 = arith.truncf %72 : vector<16x32xf32> to vector<16x32xbf16>
    %cst_26 = arith.constant dense<0.000000e+00> : vector<16x128xf32>
    %74 = tpu.matmul %73, %6, %cst_26 {dimension_numbers = #tpu.dot_dimension_numbers<[1], [0], [0], [1], [0, 0, 1, 1], [], []>} : vector<16x32xbf16>, vector<32x128xbf16>, vector<16x128xf32> -> vector<16x128xf32>
    %75 = vector.broadcast %11 : vector<1x128xf32> to vector<16x128xf32>
    %76 = arith.addf %74, %75 : vector<16x128xf32>
    %cst_27 = arith.constant 0.000000e+00 : f32
    %77 = vector.broadcast %cst_27 : f32 to vector<16x128xf32>
    %78 = arith.cmpf ogt, %76, %77 : vector<16x128xf32>
    %79 = vector.broadcast %12 : vector<1x128xf32> to vector<16x128xf32>
    %80 = arith.mulf %79, %76 : vector<16x128xf32>
    %81 = arith.select %78, %76, %80 : vector<16x128xi1>, vector<16x128xf32>
    %82 = arith.truncf %81 : vector<16x128xf32> to vector<16x128xbf16>
    %cst_28 = arith.constant dense<0.000000e+00> : vector<16x32xf32>
    %83 = tpu.matmul %82, %8, %cst_28 {dimension_numbers = #tpu.dot_dimension_numbers<[1], [0], [0], [1], [0, 0, 1, 1], [], []>} : vector<16x128xbf16>, vector<128x32xbf16>, vector<16x32xf32> -> vector<16x32xf32>
    %84 = vector.broadcast %15 : vector<1x32xf32> to vector<16x32xf32>
    %85 = arith.addf %83, %84 : vector<16x32xf32>
    %86 = arith.addf %72, %85 : vector<16x32xf32>
    %cst_29 = arith.constant dense<0.000000e+00> : vector<16xf32>
    %87 = vector.multi_reduction <add>, %86, %cst_29 [1] : vector<16x32xf32> to vector<16xf32>
    %88 = vector.shape_cast %87 : vector<16xf32> to vector<16x1xf32>
    %cst_30 = arith.constant 3.200000e+01 : f32
    %89 = vector.broadcast %cst_30 : f32 to vector<16x1xf32>
    %90 = arith.divf %88, %89 : vector<16x1xf32>
    %91 = vector.broadcast %90 : vector<16x1xf32> to vector<16x32xf32>
    %92 = arith.subf %86, %91 : vector<16x32xf32>
    %93 = arith.mulf %92, %92 : vector<16x32xf32>
    %cst_31 = arith.constant dense<0.000000e+00> : vector<16xf32>
    %94 = vector.multi_reduction <add>, %93, %cst_31 [1] : vector<16x32xf32> to vector<16xf32>
    %95 = vector.shape_cast %94 : vector<16xf32> to vector<16x1xf32>
    %cst_32 = arith.constant 3.200000e+01 : f32
    %96 = vector.broadcast %cst_32 : f32 to vector<16x1xf32>
    %97 = arith.divf %95, %96 : vector<16x1xf32>
    %98 = vector.broadcast %90 : vector<16x1xf32> to vector<16x32xf32>
    %99 = arith.subf %86, %98 : vector<16x32xf32>
    %cst_33 = arith.constant 9.99999974E-6 : f32
    %100 = vector.broadcast %cst_33 : f32 to vector<16x1xf32>
    %101 = arith.addf %97, %100 : vector<16x1xf32>
    %102 = math.rsqrt %101 : vector<16x1xf32>
    %103 = vector.broadcast %102 : vector<16x1xf32> to vector<16x32xf32>
    %104 = arith.mulf %99, %103 : vector<16x32xf32>
    %105 = vector.broadcast %16 : vector<1x32xf32> to vector<16x32xf32>
    %106 = arith.mulf %104, %105 : vector<16x32xf32>
    %107 = vector.broadcast %17 : vector<1x32xf32> to vector<16x32xf32>
    %108 = arith.addf %106, %107 : vector<16x32xf32>
    %c1 = arith.constant 1 : index
    %c0_34 = arith.constant 0 : index
    %c0_35 = arith.constant 0 : index
    %109 = vector.load %arg3[%c1, %c0_34, %c0_35] : memref<2x32x96xbf16, #tpu.memory_space<vmem>>, vector<1x32x96xbf16>
    %110 = vector.shape_cast %109 : vector<1x32x96xbf16> to vector<32x96xbf16>
    %c1_36 = arith.constant 1 : index
    %c0_37 = arith.constant 0 : index
    %c0_38 = arith.constant 0 : index
    %111 = vector.load %arg4[%c1_36, %c0_37, %c0_38] : memref<2x32x128xbf16, #tpu.memory_space<vmem>>, vector<1x32x128xbf16>
    %112 = vector.shape_cast %111 : vector<1x32x128xbf16> to vector<32x128xbf16>
    %c1_39 = arith.constant 1 : index
    %c0_40 = arith.constant 0 : index
    %c0_41 = arith.constant 0 : index
    %113 = vector.load %arg5[%c1_39, %c0_40, %c0_41] : memref<2x128x32xbf16, #tpu.memory_space<vmem>>, vector<1x128x32xbf16>
    %114 = vector.shape_cast %113 : vector<1x128x32xbf16> to vector<128x32xbf16>
    %c1_42 = arith.constant 1 : index
    %c0_43 = arith.constant 0 : index
    %c0_44 = arith.constant 0 : index
    %115 = vector.load %arg6[%c1_42, %c0_43, %c0_44] : memref<2x8x128xf32, #tpu.memory_space<vmem>>, vector<1x8x128xf32>
    %116 = vector.shape_cast %115 : vector<1x8x128xf32> to vector<8x128xf32>
    %117 = vector.extract_strided_slice %116 {offsets = [0, 0], sizes = [1, 128], strides = [1, 1]} : vector<8x128xf32> to vector<1x128xf32>
    %118 = vector.extract_strided_slice %116 {offsets = [1, 0], sizes = [1, 128], strides = [1, 1]} : vector<8x128xf32> to vector<1x128xf32>
    %119 = vector.extract_strided_slice %116 {offsets = [2, 0], sizes = [1, 32], strides = [1, 1]} : vector<8x128xf32> to vector<1x32xf32>
    %120 = vector.extract_strided_slice %116 {offsets = [3, 0], sizes = [1, 32], strides = [1, 1]} : vector<8x128xf32> to vector<1x32xf32>
    %121 = vector.extract_strided_slice %116 {offsets = [4, 0], sizes = [1, 32], strides = [1, 1]} : vector<8x128xf32> to vector<1x32xf32>
    %122 = vector.extract_strided_slice %116 {offsets = [5, 0], sizes = [1, 32], strides = [1, 1]} : vector<8x128xf32> to vector<1x32xf32>
    %123 = vector.extract_strided_slice %116 {offsets = [6, 0], sizes = [1, 32], strides = [1, 1]} : vector<8x128xf32> to vector<1x32xf32>
    %124 = arith.truncf %108 : vector<16x32xf32> to vector<16x32xbf16>
    %cst_45 = arith.constant dense<0.000000e+00> : vector<16x96xf32>
    %125 = tpu.matmul %124, %110, %cst_45 {dimension_numbers = #tpu.dot_dimension_numbers<[1], [0], [0], [1], [0, 0, 1, 1], [], []>} : vector<16x32xbf16>, vector<32x96xbf16>, vector<16x96xf32> -> vector<16x96xf32>
    %126 = vector.extract_strided_slice %125 {offsets = [0, 0], sizes = [16, 32], strides = [1, 1]} : vector<16x96xf32> to vector<16x32xf32>
    %127 = vector.extract_strided_slice %125 {offsets = [0, 32], sizes = [16, 32], strides = [1, 1]} : vector<16x96xf32> to vector<16x32xf32>
    %128 = vector.extract_strided_slice %125 {offsets = [0, 64], sizes = [16, 32], strides = [1, 1]} : vector<16x96xf32> to vector<16x32xf32>
    %129 = tpu.concatenate %126, %126, %126, %126 in 0 : vector<16x32xf32>, vector<16x32xf32>, vector<16x32xf32>, vector<16x32xf32> -> vector<64x32xf32>
    %130 = arith.mulf %129, %2 : vector<64x32xf32>
    %131 = arith.truncf %130 : vector<64x32xf32> to vector<64x32xbf16>
    %132 = arith.truncf %127 : vector<16x32xf32> to vector<16x32xbf16>
    %cst_46 = arith.constant dense<0.000000e+00> : vector<64x16xf32>
    %133 = tpu.matmul %131, %132, %cst_46 {dimension_numbers = #tpu.dot_dimension_numbers<[1], [1], [0], [0], [0, 0, 1, 0], [], []>} : vector<64x32xbf16>, vector<16x32xbf16>, vector<64x16xf32> -> vector<64x16xf32>
    %134 = arith.addf %133, %1 : vector<64x16xf32>
    %cst_47 = arith.constant dense<0xFF800000> : vector<64xf32>
    %135 = vector.multi_reduction <maximumf>, %134, %cst_47 [1] : vector<64x16xf32> to vector<64xf32>
    %136 = vector.shape_cast %135 : vector<64xf32> to vector<64x1xf32>
    %137 = vector.broadcast %136 : vector<64x1xf32> to vector<64x16xf32>
    %138 = arith.subf %134, %137 : vector<64x16xf32>
    %139 = math.exp %138 : vector<64x16xf32>
    %cst_48 = arith.constant dense<0.000000e+00> : vector<64xf32>
    %140 = vector.multi_reduction <add>, %139, %cst_48 [1] : vector<64x16xf32> to vector<64xf32>
    %141 = vector.shape_cast %140 : vector<64xf32> to vector<64x1xf32>
    %142 = tpu.reciprocal %141 {approx = true} : vector<64x1xf32> -> vector<64x1xf32>
    %143 = vector.broadcast %142 : vector<64x1xf32> to vector<64x16xf32>
    %144 = arith.mulf %139, %143 : vector<64x16xf32>
    %145 = arith.truncf %144 : vector<64x16xf32> to vector<64x16xbf16>
    %146 = arith.truncf %128 : vector<16x32xf32> to vector<16x32xbf16>
    %cst_49 = arith.constant dense<0.000000e+00> : vector<64x32xf32>
    %147 = tpu.matmul %145, %146, %cst_49 {dimension_numbers = #tpu.dot_dimension_numbers<[1], [0], [0], [1], [0, 0, 1, 1], [], []>} : vector<64x16xbf16>, vector<16x32xbf16>, vector<64x32xf32> -> vector<64x32xf32>
    %148 = arith.mulf %147, %2 : vector<64x32xf32>
    %149 = vector.extract_strided_slice %148 {offsets = [0, 0], sizes = [16, 32], strides = [1, 1]} : vector<64x32xf32> to vector<16x32xf32>
    %150 = vector.extract_strided_slice %148 {offsets = [16, 0], sizes = [16, 32], strides = [1, 1]} : vector<64x32xf32> to vector<16x32xf32>
    %151 = arith.addf %149, %150 : vector<16x32xf32>
    %152 = vector.extract_strided_slice %148 {offsets = [32, 0], sizes = [16, 32], strides = [1, 1]} : vector<64x32xf32> to vector<16x32xf32>
    %153 = arith.addf %151, %152 : vector<16x32xf32>
    %154 = vector.extract_strided_slice %148 {offsets = [48, 0], sizes = [16, 32], strides = [1, 1]} : vector<64x32xf32> to vector<16x32xf32>
    %155 = arith.addf %153, %154 : vector<16x32xf32>
    %156 = arith.addf %155, %108 : vector<16x32xf32>
    %cst_50 = arith.constant dense<0.000000e+00> : vector<16xf32>
    %157 = vector.multi_reduction <add>, %156, %cst_50 [1] : vector<16x32xf32> to vector<16xf32>
    %158 = vector.shape_cast %157 : vector<16xf32> to vector<16x1xf32>
    %cst_51 = arith.constant 3.200000e+01 : f32
    %159 = vector.broadcast %cst_51 : f32 to vector<16x1xf32>
    %160 = arith.divf %158, %159 : vector<16x1xf32>
    %161 = vector.broadcast %160 : vector<16x1xf32> to vector<16x32xf32>
    %162 = arith.subf %156, %161 : vector<16x32xf32>
    %163 = arith.mulf %162, %162 : vector<16x32xf32>
    %cst_52 = arith.constant dense<0.000000e+00> : vector<16xf32>
    %164 = vector.multi_reduction <add>, %163, %cst_52 [1] : vector<16x32xf32> to vector<16xf32>
    %165 = vector.shape_cast %164 : vector<16xf32> to vector<16x1xf32>
    %cst_53 = arith.constant 3.200000e+01 : f32
    %166 = vector.broadcast %cst_53 : f32 to vector<16x1xf32>
    %167 = arith.divf %165, %166 : vector<16x1xf32>
    %168 = vector.broadcast %160 : vector<16x1xf32> to vector<16x32xf32>
    %169 = arith.subf %156, %168 : vector<16x32xf32>
    %cst_54 = arith.constant 9.99999974E-6 : f32
    %170 = vector.broadcast %cst_54 : f32 to vector<16x1xf32>
    %171 = arith.addf %167, %170 : vector<16x1xf32>
    %172 = math.rsqrt %171 : vector<16x1xf32>
    %173 = vector.broadcast %172 : vector<16x1xf32> to vector<16x32xf32>
    %174 = arith.mulf %169, %173 : vector<16x32xf32>
    %175 = vector.broadcast %119 : vector<1x32xf32> to vector<16x32xf32>
    %176 = arith.mulf %174, %175 : vector<16x32xf32>
    %177 = vector.broadcast %120 : vector<1x32xf32> to vector<16x32xf32>
    %178 = arith.addf %176, %177 : vector<16x32xf32>
    %179 = arith.truncf %178 : vector<16x32xf32> to vector<16x32xbf16>
    %cst_55 = arith.constant dense<0.000000e+00> : vector<16x128xf32>
    %180 = tpu.matmul %179, %112, %cst_55 {dimension_numbers = #tpu.dot_dimension_numbers<[1], [0], [0], [1], [0, 0, 1, 1], [], []>} : vector<16x32xbf16>, vector<32x128xbf16>, vector<16x128xf32> -> vector<16x128xf32>
    %181 = vector.broadcast %117 : vector<1x128xf32> to vector<16x128xf32>
    %182 = arith.addf %180, %181 : vector<16x128xf32>
    %cst_56 = arith.constant 0.000000e+00 : f32
    %183 = vector.broadcast %cst_56 : f32 to vector<16x128xf32>
    %184 = arith.cmpf ogt, %182, %183 : vector<16x128xf32>
    %185 = vector.broadcast %118 : vector<1x128xf32> to vector<16x128xf32>
    %186 = arith.mulf %185, %182 : vector<16x128xf32>
    %187 = arith.select %184, %182, %186 : vector<16x128xi1>, vector<16x128xf32>
    %188 = arith.truncf %187 : vector<16x128xf32> to vector<16x128xbf16>
    %cst_57 = arith.constant dense<0.000000e+00> : vector<16x32xf32>
    %189 = tpu.matmul %188, %114, %cst_57 {dimension_numbers = #tpu.dot_dimension_numbers<[1], [0], [0], [1], [0, 0, 1, 1], [], []>} : vector<16x128xbf16>, vector<128x32xbf16>, vector<16x32xf32> -> vector<16x32xf32>
    %190 = vector.broadcast %121 : vector<1x32xf32> to vector<16x32xf32>
    %191 = arith.addf %189, %190 : vector<16x32xf32>
    %192 = arith.addf %178, %191 : vector<16x32xf32>
    %cst_58 = arith.constant dense<0.000000e+00> : vector<16xf32>
    %193 = vector.multi_reduction <add>, %192, %cst_58 [1] : vector<16x32xf32> to vector<16xf32>
    %194 = vector.shape_cast %193 : vector<16xf32> to vector<16x1xf32>
    %cst_59 = arith.constant 3.200000e+01 : f32
    %195 = vector.broadcast %cst_59 : f32 to vector<16x1xf32>
    %196 = arith.divf %194, %195 : vector<16x1xf32>
    %197 = vector.broadcast %196 : vector<16x1xf32> to vector<16x32xf32>
    %198 = arith.subf %192, %197 : vector<16x32xf32>
    %199 = arith.mulf %198, %198 : vector<16x32xf32>
    %cst_60 = arith.constant dense<0.000000e+00> : vector<16xf32>
    %200 = vector.multi_reduction <add>, %199, %cst_60 [1] : vector<16x32xf32> to vector<16xf32>
    %201 = vector.shape_cast %200 : vector<16xf32> to vector<16x1xf32>
    %cst_61 = arith.constant 3.200000e+01 : f32
    %202 = vector.broadcast %cst_61 : f32 to vector<16x1xf32>
    %203 = arith.divf %201, %202 : vector<16x1xf32>
    %204 = vector.broadcast %196 : vector<16x1xf32> to vector<16x32xf32>
    %205 = arith.subf %192, %204 : vector<16x32xf32>
    %cst_62 = arith.constant 9.99999974E-6 : f32
    %206 = vector.broadcast %cst_62 : f32 to vector<16x1xf32>
    %207 = arith.addf %203, %206 : vector<16x1xf32>
    %208 = math.rsqrt %207 : vector<16x1xf32>
    %209 = vector.broadcast %208 : vector<16x1xf32> to vector<16x32xf32>
    %210 = arith.mulf %205, %209 : vector<16x32xf32>
    %211 = vector.broadcast %122 : vector<1x32xf32> to vector<16x32xf32>
    %212 = arith.mulf %210, %211 : vector<16x32xf32>
    %213 = vector.broadcast %123 : vector<1x32xf32> to vector<16x32xf32>
    %214 = arith.addf %212, %213 : vector<16x32xf32>
    %c0_63 = arith.constant 0 : index
    %c0_64 = arith.constant 0 : index
    %215 = vector.load %arg7[%c0_63, %c0_64] : memref<16x32xf32, #tpu.memory_space<vmem>>, vector<16x32xf32>
    tpu.vector_store %arg7[%c0_63, %c0_64], %214 {strides = array<i32>} : memref<16x32xf32, #tpu.memory_space<vmem>>, vector<16x32xf32>,
    return
  }
}

</mosaic_0001>

<bundles_post_ra>
// kernel: graph_transformer_forward.1
= control target key start
LH: loop header
LB: loop body
LE: loop exit
PB: predicated region body
PF: predicated region fallthrough
CT: control target
= control target key end

     0   :  { %12 = vsyncpa [#allocation3], 0  ;;  %s2200_s0 = inlined_call_operand.hbm [shape: f32[16,32], index: 0, kind: input, shape index: {}, may-alias: {0,7}]   ;;  %s2201_s1 = inlined_call_operand.vmem [shape: f32[64,16], index: 1, kind: input, shape index: {}]   ;;  %s2202_s2 = inlined_call_operand.vmem [shape: f32[64,32], index: 2, kind: input, shape index: {}]   ;;  %s2203_s3 = inlined_call_operand.vmem [shape: bf16[2,32,96], index: 3, kind: input, shape index: {}]   ;;  %s2204_s4 = inlined_call_operand.vmem [shape: bf16[2,32,128], index: 4, kind: input, shape index: {}]   ;;  %s2205_s5 = inlined_call_operand.vmem [shape: bf16[2,128,32], index: 5, kind: input, shape index: {}]   ;;  %s2206_s6 = inlined_call_operand.vmem [shape: f32[2,8,128], index: 6, kind: input, shape index: {}]   ;;  %s2207_s7 = inlined_call_operand.hbm [shape: f32[16,32], index: 7, kind: output, shape index: {}, may-alias: {0,7}]  }
   0x1   :  { %13 = vsyncpa [#allocation4], 0  ;;  %s1703_s24 = smov [#allocation2]   ;;  %s1655_s28 = scalar_lea.hbm %s2200_s0, 256 }
   0x2   :  { %s19_s25 = sshll.u32 %s1703_s24, 4  ;;  %p1656_p0 = scmp.ne.s32.totalorder %s2200_s0, %s1655_s28  ;;  %s20_s25 = int_to_ptr.vmem [resolvable:$true] %s19_s25 }
   0x3   :  { %p1659_p1 = scmp.lt.u32.totalorder %s1655_s28, %s2200_s0 }
   0x5   :  { %p1661_p2 = pnand %p1659_p1, %p1656_p0 }
   0x7   :  { %1664 = shalt.err (!%p1661_p2)
}
   0x8   :  { %s1665_s10 = scalar_lea.vmem %s20_s25, 256  ;;  %p1670_p4 = scmp.lt.s32.totalorder %s20_s25, %s20_s25 }
   0x9   :  { %p1666_p3 = scmp.ne.s32.totalorder %s20_s25, %s1665_s10  ;;  %p1671_p5 = scmp.lt.s32.totalorder %s1665_s10, %s1665_s10 }
   0xb   :  { %p1672_p6 = por %p1671_p5, %p1670_p4 }
   0xd   :  { %p1673_p7 = pnand %p1672_p6, %p1666_p3 }
   0xf   :  { %1676 = shalt.err (!%p1673_p7)
}
  0x10   :  { %s1704_s11 = smov 128   ;;  %s1705_s12 = smov 8  }
  0x11   :  { %25 = dma.hbm_to_vmem [thread:$0]  %s2200_s0, 256, %s20_s25, [#allocation3], %s1704_s11, %s1704_s11, %s1705_s12  }
  0x12   :  { %1699 = dma.done.wait [#allocation3], 256  }
  0x13   :  { %1700 = vsyncadd [#allocation3], 4294967040  ;;  %v1706_v0 = vmov 0.0   ;;  %vm1707_vm0 = vmmov 0   ;;  %v1545_v1 = vld [vmem:[%s2203_s3] sm:$0xff]   ;;  %v1546_v2 = vld [vmem:[%s2203_s3 + $0x8] sm:$0xff]  }
  0x14   :  { %1423 = vmatprep.subr.bf16.mxu1 %v1706_v0  ;;  %1427 = vmatprep.mubr.msk.bf16.mxu1 %vm1707_vm0, %v1706_v0  ;;  %v1775_v3 = vld [vmem:[#allocation2] sm:$0xff]  ;;  %v1777_v4 = vld [vmem:[#allocation2 + $0x8] sm:$0xff]  ;;  %vm98_vm1 = vcmask 261120   ;;  %v1791_v7 = vld [vmem:[%s2202_s2 + $0x10] sm:$0xff]  ;;  %s1708_s13 = smov 96   ;;  %vm239_vm2 = vcmask 130048  }
  0x15   :  { %1424 = vmatpush3.bf16.msra.mxu1 %v1545_v1  ;;  %v85_v5 = vpack.c.bf16 %v1777_v4, %v1775_v3  ;;  %v1786_v6 = vld [vmem:[%s2202_s2] sm:$0xff]  ;;  %v1801_v9 = vld [vmem:[%s2202_s2 + $0x30] sm:$0xff]  ;;  %v1806_v10 = vld [vmem:[%s2202_s2 + $0x8] sm:$0xff] }
  0x16   :  { %1425 = vmatprep.subr.bf16.mxu1 %v1706_v0  ;;  %v1796_v8 = vld [vmem:[%s2202_s2 + $0x20] sm:$0xff]  ;;  %v1811_v12 = vld [vmem:[%s2202_s2 + $0x18] sm:$0xff]  ;;  %v1816_v13 = vld [vmem:[%s2202_s2 + $0x28] sm:$0xff] }
  0x17   :  { %v1821_v14 = vld [vmem:[%s2202_s2 + $0x38] sm:$0xff]  ;;  %v1847_v33 = vld [vmem:[%s2201_s1 + $0x10] sm:$0xff]  ;;  %v1852_v34 = vld [vmem:[%s2201_s1] sm:$0xff] }
  0x18   :  { %v1857_v36 = vld [vmem:[%s2201_s1 + $0x18] sm:$0xff]  ;;  %v1866_v44 = vld [vmem:[%s2201_s1 + $0x8] sm:$0xff]  ;;  %v1874_v48 = vld [vmem:[%s2201_s1 + $0x30] sm:$0xff] }
  0x19   :  { %1426 = vmatpush3.bf16.msra.mxu1 %v1546_v2  ;;  %v1881_v55 = vld [vmem:[%s2201_s1 + $0x20] sm:$0xff]  ;;  %v1888_v58 = vld [vmem:[%s2201_s1 + $0x28] sm:$0xff]  ;;  %v1895_v61 = vld [vmem:[%s2201_s1 + $0x38] sm:$0xff]  ;;  %s1709_s1 = smov 64  }
  0x1c   :  { %1428 = vmatmul.mubr.msk.bf16.vlgmr.msra.gmra.mrb[0].mxu1 %vm98_vm1, %v85_v5 }
  0xef   :  { %v136_v11 = vpop.f32.mrb[0].mxu1 }
  0xf0   :  { %v1429_v15 = vpop.f32.mrb[1].mxu1  ;;  %v143_v16 = vmul.f32 %v136_v11, %v1786_v6  ;;  %v145_v17 = vmul.f32 %v136_v11, %v1791_v7  ;;  %v147_v18 = vmul.f32 %v136_v11, %v1796_v8  ;;  %v149_v19 = vmul.f32 %v136_v11, %v1801_v9 }
  0xf1   :  { %v139_v20 = vpop.f32.mrb[2].mxu1 }
  0xf2   :  { %v144_v21 = vmul.f32 %v139_v20, %v1806_v10  ;;  %v146_v22 = vmul.f32 %v139_v20, %v1811_v12  ;;  %v148_v23 = vmul.f32 %v139_v20, %v1816_v13  ;;  %v150_v24 = vmul.f32 %v139_v20, %v1821_v14  ;;  %v1430_v25 = vpop.f32.mrb[3].mxu1 }
  0xf3   :  { %v1831_v26 = vpack.c.bf16 %v139_v20, %v136_v11 }
  0xf4   :  { %v152_v27 = vpack.c.bf16 %v146_v22, %v145_v17  ;;  %v151_v28 = vpack.c.bf16 %v144_v21, %v143_v16  ;;  %v153_v29 = vpack.c.bf16 %v148_v23, %v147_v18  ;;  %v154_v30 = vpack.c.bf16 %v150_v24, %v149_v19 }
  0xf5   :  { %157 = vrot.lane.b32.xlu0 %v1831_v26, %s1708_s13 }
  0xf6   :  { %1433 = vmatprep.mubr.msk.bf16.mxu1 %vm98_vm1, %v151_v28 }
 0x167   :  { %v158_v31 = vpop.permute.xlu0 %157 }
 0x168   :  { %v172_v32 = vsel %vm98_vm1, %v158_v31, 0  ;;  %1535 = vmatprep.subr.msk.bf16.mxu1 %vm98_vm1, %v158_v31 }
 0x169   :  { %1432 = vmatpush3.bf16.xpose.msra.mxu1 %v172_v32 }
 0x16a   :  { %1451 = vmatprep.subr.bf16.mxu1 %v1706_v0 }
 0x170   :  { %1434 = vmatmul.mubr.msk.bf16.vlgmr.msra.gmra.mrb[4].mxu1 %vm98_vm1, %v152_v27 }
 0x171   :  { %1437 = vmatprep.mubr.msk.bf16.mxu1 %vm98_vm1, %v153_v29 }
 0x178   :  { %1438 = vmatmul.mubr.msk.bf16.gmra.mrb[8].mxu1 %vm98_vm1, %v154_v30 }
 0x179   :  { %1455 = vmatprep.mubr.msk.bf16.mxu1 %vm1707_vm0, %v1706_v0 }
 0x243   :  { %v1435_v35 = vpop.f32.mrb[4].mxu1 }
 0x244   :  { %v217_v37 = vadd.f32 %v1435_v35, %v1847_v33  ;;  %v208_v38 = vpop.f32.mrb[5].mxu1 }
 0x245   :  { %v209_v39 = vadd.f32 %v208_v38, %v1852_v34  ;;  %v1436_v40 = vpop.f32.mrb[6].mxu1 }
 0x246   :  { %v220_v41 = vadd.f32 %v1436_v40, %v1857_v36  ;;  %v211_v42 = vpop.f32.mrb[7].mxu1  ;;  %v246_v43 = vsel %vm239_vm2, %v217_v37, -inf }
 0x247   :  { %247 = vmax.xlane.f32.xlu1 %v246_v43  ;;  %v240_v45 = vsel %vm239_vm2, %v209_v39, -inf  ;;  %v212_v46 = vadd.f32 %v211_v42, %v1866_v44 }
 0x248   :  { %241 = vmax.xlane.f32.xlu0 %v240_v45  ;;  %v249_v47 = vsel %vm239_vm2, %v220_v41, -inf }
 0x249   :  { %v243_v54 = vsel %vm239_vm2, %v212_v46, -inf }
 0x24b   :  { %250 = vmax.xlane.f32.xlu1 %v249_v47  ;;  %v1439_v49 = vpop.f32.mrb[8].mxu1 }
 0x24c   :  { %v224_v50 = vpop.f32.mrb[9].mxu1  ;;  %v233_v52 = vadd.f32 %v1439_v49, %v1874_v48 }
 0x24d   :  { %v1440_v51 = vpop.f32.mrb[10].mxu1  ;;  %v225_v56 = vadd.f32 %v224_v50, %v1881_v55 }
 0x24e   :  { %v227_v53 = vpop.f32.mrb[11].mxu1  ;;  %v258_v57 = vsel %vm239_vm2, %v233_v52, -inf  ;;  %v236_v62 = vadd.f32 %v1440_v51, %v1895_v61 }
 0x24f   :  { %244 = vmax.xlane.f32.xlu1 %v243_v54  ;;  %v228_v59 = vadd.f32 %v227_v53, %v1888_v58  ;;  %v252_v60 = vsel %vm239_vm2, %v225_v56, -inf }
 0x250   :  { %v261_v1 = vsel %vm239_vm2, %v236_v62, -inf }
 0x251   :  { %v255_v63 = vsel %vm239_vm2, %v228_v59, -inf }
 0x253   :  { %259 = vmax.xlane.f32.xlu1 %v258_v57 }
 0x257   :  { %253 = vmax.xlane.f32.xlu1 %v252_v60 }
 0x25b   :  { %256 = vmax.xlane.f32.xlu1 %v255_v63 }
 0x25f   :  { %262 = vmax.xlane.f32.xlu1 %v261_v1 }
 0x2d4   :  { %v248_v2 = vpop.xlane.xlu1 %247 }
 0x2d5   :  { %v266_v5 = vsub.f32 %v217_v37, %v248_v2  ;;  %v242_v11 = vpop.xlane.xlu0 %241 }
 0x2d6   :  { %v264_v15 = vsub.f32 %v209_v39, %v242_v11 }
 0x2d7   :  { %v276_v16 = vmul.f32 1.442695, %v266_v5 }
 0x2d8   :  { %v272_v17 = vmul.f32 1.442695, %v264_v15  ;;  %v251_v18 = vpop.xlane.xlu1 %250 }
 0x2d9   :  { %1569 = vpow2.f32 %v276_v16  ;;  %v267_v19 = vsub.f32 %v220_v41, %v251_v18 }
 0x2da   :  { %1571 = vpow2.f32 %v272_v17 }
 0x2db   :  { %v278_v22 = vmul.f32 1.442695, %v267_v19 }
 0x2dc   :  { %v245_v20 = vpop.xlane.xlu1 %244 }
 0x2dd   :  { %v265_v21 = vsub.f32 %v212_v46, %v245_v20 }
 0x2df   :  { %v274_v23 = vmul.f32 1.442695, %v265_v21 }
 0x2e0   :  { %v260_v24 = vpop.xlane.xlu1 %259 }
 0x2e1   :  { %1573 = vpow2.f32 %v274_v23  ;;  %v270_v25 = vsub.f32 %v233_v52, %v260_v24 }
 0x2e2   :  { %1575 = vpow2.f32 %v278_v22 }
 0x2e3   :  { %v1900_v27 = vpop.eup %1569  ;;  %v284_v28 = vmul.f32 1.442695, %v270_v25 }
 0x2e4   :  { %v1572_v29 = vpop.eup %1571  ;;  %v254_v30 = vpop.xlane.xlu1 %253  ;;  %v294_v31 = vsel %vm239_vm2, %v1900_v27, 0.0 }
 0x2e5   :  { %1577 = vpow2.f32 %v284_v28  ;;  %v268_v32 = vsub.f32 %v225_v56, %v254_v30  ;;  %295 = vadd.xlane.f32.xlu0 %v294_v31  ;;  %v288_v35 = vsel %vm239_vm2, %v1572_v29, 0.0 }
 0x2e6   :  { %289 = vadd.xlane.f32.xlu1 %v288_v35 }
 0x2e7   :  { %v280_v37 = vmul.f32 1.442695, %v268_v32 }
 0x2e8   :  { %v257_v38 = vpop.xlane.xlu1 %256 }
 0x2e9   :  { %1579 = vpow2.f32 %v280_v37  ;;  %v269_v39 = vsub.f32 %v228_v59, %v257_v38 }
 0x2eb   :  { %v1574_v40 = vpop.eup %1573  ;;  %v282_v41 = vmul.f32 1.442695, %v269_v39 }
 0x2ec   :  { %v263_v42 = vpop.xlane.xlu1 %262  ;;  %v291_v43 = vsel %vm239_vm2, %v1574_v40, 0.0  ;;  %v1576_v45 = vpop.eup %1575 }
 0x2ed   :  { %1581 = vpow2.f32 %v282_v41  ;;  %v271_v46 = vsub.f32 %v236_v62, %v263_v42  ;;  %292 = vadd.xlane.f32.xlu1 %v291_v43  ;;  %v297_v51 = vsel %vm239_vm2, %v1576_v45, 0.0 }
 0x2ef   :  { %v1578_v47 = vpop.eup %1577  ;;  %v286_v49 = vmul.f32 1.442695, %v271_v46 }
 0x2f0   :  { %v306_v50 = vsel %vm239_vm2, %v1578_v47, 0.0 }
 0x2f1   :  { %1583 = vpow2.f32 %v286_v49  ;;  %307 = vadd.xlane.f32.xlu0 %v306_v50  ;;  %298 = vadd.xlane.f32.xlu1 %v297_v51 }
 0x2f3   :  { %v1580_v52 = vpop.eup %1579 }
 0x2f4   :  { %v300_v53 = vsel %vm239_vm2, %v1580_v52, 0.0 }
 0x2f5   :  { %301 = vadd.xlane.f32.xlu0 %v300_v53 }
 0x2f7   :  { %v1582_v54 = vpop.eup %1581 }
 0x2f8   :  { %v303_v56 = vsel %vm239_vm2, %v1582_v54, 0.0 }
 0x2f9   :  { %304 = vadd.xlane.f32.xlu1 %v303_v56 }
 0x2fb   :  { %v1584_v57 = vpop.eup %1583 }
 0x2fc   :  { %v309_v59 = vsel %vm239_vm2, %v1584_v57, 0.0 }
 0x2fd   :  { %310 = vadd.xlane.f32.xlu1 %v309_v59 }
 0x30b   :  { %332 = vrot.lane.b32.xlu0 %v1831_v26, %s1709_s1 }
 0x372   :  { %v296_v62 = vpop.xlane.xlu0 %295 }
 0x373   :  { %v290_v60 = vpop.xlane.xlu1 %289 }
 0x374   :  { %1585 = vrcp.f32 %v290_v60 }
 0x37a   :  { %v293_v63 = vpop.xlane.xlu1 %292 }
 0x37b   :  { %1587 = vrcp.f32 %v293_v63 }
 0x37c   :  { %1589 = vrcp.f32 %v296_v62 }
 0x37e   :  { %v299_v1 = vpop.xlane.xlu1 %298  ;;  %v308_v2 = vpop.xlane.xlu0 %307 }
 0x37f   :  { %1591 = vrcp.f32 %v299_v1  ;;  %v1586_v11 = vpop.eup %1585 }
 0x380   :  { %v320_v18 = vmul.f32 %v1586_v11, %v1572_v29 }
 0x382   :  { %v302_v5 = vpop.xlane.xlu0 %301 }
 0x383   :  { %1593 = vrcp.f32 %v302_v5 }
 0x385   :  { %v1588_v15 = vpop.eup %1587 }
 0x386   :  { %v305_v16 = vpop.xlane.xlu1 %304  ;;  %v333_v17 = vpop.permute.xlu0 %332  ;;  %v321_v19 = vmul.f32 %v1588_v15, %v1574_v40 }
 0x387   :  { %v1590_v20 = vpop.eup %1589  ;;  %1595 = vrcp.f32 %v305_v16  ;;  %1441 = vmatprep.subr.bf16.mxu0 %v333_v17 }
 0x388   :  { %1442 = vmatpush3.bf16.msra.mxu0 %v333_v17  ;;  %v328_v26 = vpack.c.bf16 %v321_v19, %v320_v18  ;;  %1597 = vrcp.f32 %v308_v2  ;;  %v322_v23 = vmul.f32 %v1590_v20, %v1900_v27 }
 0x389   :  { %v1592_v21 = vpop.eup %1591  ;;  %1459 = vmatprep.subr.bf16.mxu0 %v1706_v0 }
 0x38a   :  { %1443 = vmatprep.mubr.msk.bf16.mxu0 %vm239_vm2, %v328_v26  ;;  %v311_v22 = vpop.xlane.xlu1 %310  ;;  %v323_v24 = vmul.f32 %v1592_v21, %v1576_v45 }
 0x38b   :  { %1599 = vrcp.f32 %v311_v22 }
 0x38c   :  { %v329_v25 = vpack.c.bf16 %v323_v24, %v322_v23 }
 0x38d   :  { %v1594_v28 = vpop.eup %1593 }
 0x38e   :  { %1444 = vmatmul.mubr.msk.bf16.vlgmr.msra.gmra.mrb[0].mxu0 %vm239_vm2, %v329_v25  ;;  %v324_v30 = vmul.f32 %v1594_v28, %v1580_v52  ;;  %v1548_v28 = vld [vmem:[%s2204_s4 + $0x8] sm:$0xff]  }
 0x391   :  { %v1596_v29 = vpop.eup %1595 }
 0x392   :  { %v325_v31 = vmul.f32 %v1596_v29, %v1582_v54  ;;  %v1598_v32 = vpop.eup %1597  ;;  %v1549_v29 = vld [vmem:[%s2205_s5] sm:$0xff]  }
 0x393   :  { %v326_v38 = vmul.f32 %v1598_v32, %v1578_v47  ;;  %1460 = vmatpush3.bf16.msra.mxu0 %v1549_v29  ;;  %v1552_v32 = vld [vmem:[%s2205_s5 + $0x18] sm:$0xff]  }
 0x394   :  { %v330_v35 = vpack.c.bf16 %v325_v31, %v324_v30  ;;  %v1550_v30 = vld [vmem:[%s2205_s5 + $0x8] sm:$0xff]   ;;  %1461 = vmatprep.subr.bf16.mxu0 %v1706_v0  ;;  %v1551_v31 = vld [vmem:[%s2205_s5 + $0x10] sm:$0xff]  }
 0x395   :  { %v1600_v37 = vpop.eup %1599 }
 0x396   :  { %1447 = vmatprep.mubr.msk.bf16.mxu0 %vm239_vm2, %v330_v35  ;;  %v327_v39 = vmul.f32 %v1600_v37, %v1584_v57  ;;  %v1553_v35 = vld [vmem:[%s2205_s5 + $0x20] sm:$0xff]   ;;  %v1554_v37 = vld [vmem:[%s2205_s5 + $0x28] sm:$0xff]  }
 0x397   :  { %1462 = vmatpush3.bf16.msra.mxu0 %v1550_v30 }
 0x398   :  { %v331_v40 = vpack.c.bf16 %v327_v39, %v326_v38  ;;  %1463 = vmatprep.subr.bf16.mxu0 %v1706_v0 }
 0x39a   :  { %1448 = vmatmul.mubr.msk.bf16.gmra.mrb[4].mxu0 %vm239_vm2, %v331_v40 }
 0x39b   :  { %1475 = vmatprep.mubr.msk.bf16.mxu0 %vm1707_vm0, %v1706_v0  ;;  %1464 = vmatpush3.bf16.msra.mxu0 %v1551_v31 }
 0x39c   :  { %1465 = vmatprep.subr.bf16.mxu0 %v1706_v0 }
 0x39f   :  { %1466 = vmatpush3.bf16.msra.mxu0 %v1552_v32 }
 0x3a0   :  { %1467 = vmatprep.subr.bf16.mxu0 %v1706_v0 }
 0x3a3   :  { %1468 = vmatpush3.bf16.msra.mxu0 %v1553_v35 }
 0x3a4   :  { %1469 = vmatprep.subr.bf16.mxu0 %v1706_v0 }
 0x3a7   :  { %1470 = vmatpush3.bf16.msra.mxu0 %v1554_v37 }
 0x3a8   :  { %1471 = vmatprep.subr.bf16.mxu0 %v1706_v0 }
 0x461   :  { %v1445_v27 = vpop.f32.mrb[0].mxu0 }
 0x462   :  { %v414_v41 = vmul.f32 %v1445_v27, %v1791_v7  ;;  %v381_v42 = vpop.f32.mrb[1].mxu0  ;;  %v455_v27 = vlaneseq }
 0x463   :  { %v412_v43 = vmul.f32 %v381_v42, %v1786_v6  ;;  %v1446_v45 = vpop.f32.mrb[2].mxu0 }
 0x464   :  { %v415_v46 = vmul.f32 %v1446_v45, %v1811_v12  ;;  %v384_v49 = vpop.f32.mrb[3].mxu0  ;;  %v1967_v45 = vshrl.u32 %v455_v27, 7 }
 0x465   :  { %v420_v50 = vadd.f32 %v414_v41, %v412_v43  ;;  %v413_v47 = vmul.f32 %v384_v49, %v1806_v10  ;;  %v1973_v49 = vld [vmem:[%s2206_s6] sm:$0xff] }
 0x467   :  { %v421_v51 = vadd.f32 %v415_v46, %v413_v47  ;;  %v457_v46 = vsub.s32 2, %v1967_v45 }
 0x469   :  { %v458_v47 = vrot.slane %v1973_v49, %v457_v46 }
 0x46d   :  { %v1449_v52 = vpop.f32.mrb[4].mxu0 }
 0x46e   :  { %v397_v53 = vpop.f32.mrb[5].mxu0  ;;  %v418_v59 = vmul.f32 %v1449_v52, %v1801_v9 }
 0x46f   :  { %v416_v54 = vmul.f32 %v397_v53, %v1796_v8  ;;  %v1450_v56 = vpop.f32.mrb[6].mxu0 }
 0x470   :  { %v400_v57 = vpop.f32.mrb[7].mxu0  ;;  %v419_v63 = vmul.f32 %v1450_v56, %v1821_v14 }
 0x471   :  { %v422_v60 = vadd.f32 %v420_v50, %v416_v54  ;;  %v417_v62 = vmul.f32 %v400_v57, %v1816_v13 }
 0x473   :  { %v423_v1 = vadd.f32 %v421_v51, %v417_v62  ;;  %v424_v2 = vadd.f32 %v422_v60, %v418_v59  ;;  %v463_v51 = vsub.s32 3, %v1967_v45 }
 0x475   :  { %v426_v5 = vadd.f32 %v424_v2, %v1775_v3  ;;  %v425_v11 = vadd.f32 %v423_v1, %v419_v63  ;;  %v464_v54 = vrot.slane %v1973_v49, %v463_v51  ;;  %v1555_v1 = vld [vmem:[%s2205_s5 + $0x30] sm:$0xff]   ;;  %v1556_v2 = vld [vmem:[%s2205_s5 + $0x38] sm:$0xff]  }
 0x476   :  { %1472 = vmatpush3.bf16.msra.mxu0 %v1555_v1 }
 0x477   :  { %v428_v15 = vsel %vm98_vm1, %v426_v5, 0.0  ;;  %v427_v16 = vadd.f32 %v425_v11, %v1777_v4  ;;  %v1547_v4 = vld [vmem:[%s2204_s4] sm:$0xff]   ;;  %1473 = vmatprep.subr.bf16.mxu0 %v1706_v0  ;;  %v532_v11 = vsub.s32 1, %v1967_v45 }
 0x478   :  { %429 = vadd.xlane.f32.xlu1 %v428_v15  ;;  %1452 = vmatpush3.bf16.msra.mxu1 %v1547_v4  ;;  %v541_v4 = vsub.s32 4, %v1967_v45 }
 0x479   :  { %v431_v17 = vsel %vm98_vm1, %v427_v16, 0.0  ;;  %1453 = vmatprep.subr.bf16.mxu1 %v1706_v0 }
 0x47a   :  { %1474 = vmatpush3.bf16.msra.mxu0 %v1556_v2 }
 0x47c   :  { %432 = vadd.xlane.f32.xlu1 %v431_v17  ;;  %1454 = vmatpush3.bf16.msra.mxu1 %v1548_v28  ;;  %v542_v28 = vrot.slane %v1973_v49, %v541_v4 }
 0x47d   :  { %1479 = vmatprep.subr.bf16.mxu1 %v1706_v0 }
 0x505   :  { %v430_v18 = vpop.xlane.xlu1 %429 }
 0x506   :  { %v435_v19 = vmul.f32 0.03125, %v430_v18 }
 0x508   :  { %v437_v20 = vsub.f32 %v426_v5, %v435_v19  ;;  %v470_v5 = vsub.s32 0, %v1967_v45 }
 0x509   :  { %v433_v26 = vpop.xlane.xlu1 %432 }
 0x50a   :  { %v436_v21 = vmul.f32 0.03125, %v433_v26  ;;  %v439_v22 = vmul.f32 %v437_v20, %v437_v20  ;;  %v471_v15 = vrot.slane %v1973_v49, %v470_v5 }
 0x50c   :  { %v438_v23 = vsub.f32 %v427_v16, %v436_v21  ;;  %v441_v24 = vsel %vm98_vm1, %v439_v22, 0.0  ;;  %v533_v16 = vrot.slane %v1973_v49, %v532_v11 }
 0x50d   :  { %442 = vadd.xlane.f32.xlu1 %v441_v24 }
 0x50e   :  { %v440_v3 = vmul.f32 %v438_v23, %v438_v23 }
 0x510   :  { %v444_v25 = vsel %vm98_vm1, %v440_v3, 0.0 }
 0x511   :  { %445 = vadd.xlane.f32.xlu1 %v444_v25 }
 0x59a   :  { %v443_v38 = vpop.xlane.xlu1 %442 }
 0x59b   :  { %v447_v39 = vmul.f32 0.03125, %v443_v38 }
 0x59d   :  { %v449_v40 = vadd.f32 1e-05, %v447_v39 }
 0x59e   :  { %v446_v41 = vpop.xlane.xlu1 %445 }
 0x59f   :  { %1601 = vrsqrt.f32 %v449_v40  ;;  %v448_v42 = vmul.f32 0.03125, %v446_v41 }
 0x5a1   :  { %v450_v43 = vadd.f32 1e-05, %v448_v42 }
 0x5a3   :  { %1603 = vrsqrt.f32 %v450_v43 }
 0x5a9   :  { %v1602_v50 = vpop.eup %1601 }
 0x5aa   :  { %v453_v52 = vmul.f32 %v1602_v50, %v437_v20 }
 0x5ac   :  { %v459_v56 = vmul.f32 %v458_v47, %v453_v52 }
 0x5ad   :  { %v1604_v53 = vpop.eup %1603 }
 0x5ae   :  { %v454_v57 = vmul.f32 %v1604_v53, %v438_v23  ;;  %v465_v60 = vadd.f32 %v464_v54, %v459_v56 }
 0x5b0   :  { %v460_v59 = vmul.f32 %v458_v47, %v454_v57 }
 0x5b2   :  { %v466_v62 = vadd.f32 %v464_v54, %v460_v59  ;;  %v1557_v59 = vld [vmem:[%s2203_s3 + $0x10] sm:$0xff]  }
 0x5b4   :  { %v467_v63 = vpack.c.bf16 %v466_v62, %v465_v60 }
 0x5b6   :  { %1456 = vmatmul.mubr.msk.bf16.vlgmr.msra.gmra.mrb[12].mxu1 %vm98_vm1, %v467_v63 }
 0x5b7   :  { %1483 = vmatprep.mubr.msk.bf16.mxu1 %vm1707_vm0, %v1706_v0  ;;  %1480 = vmatpush3.bf16.msra.mxu1 %v1557_v59 }
 0x5b8   :  { %1481 = vmatprep.subr.bf16.mxu1 %v1706_v0 }
 0x689   :  { %v521_v17 = vpop.f32.mrb[12].mxu1 }
 0x68a   :  { %v522_v18 = vadd.f32 %v521_v17, %v471_v15  ;;  %v1457_v19 = vpop.f32.mrb[13].mxu1  ;;  %v662_v17 = vsub.s32 5, %v1967_v45 }
 0x68b   :  { %v524_v20 = vpop.f32.mrb[14].mxu1 }
 0x68c   :  { %v534_v26 = vmul.f32 %v533_v16, %v522_v18  ;;  %v525_v21 = vadd.f32 %v524_v20, %v471_v15  ;;  %v1458_v22 = vpop.f32.mrb[15].mxu1  ;;  %vm528_vm3 = vcmp.gt.f32.partialorder %v522_v18, 0.0  ;;  %v663_v19 = vrot.slane %v1973_v49, %v662_v17 }
 0x68e   :  { %vm529_vm4 = vcmp.gt.f32.partialorder %v525_v21, 0.0  ;;  %v535_v23 = vmul.f32 %v533_v16, %v525_v21  ;;  %v536_v24 = vsel %vm528_vm3, %v522_v18, %v534_v26  ;;  %v668_v26 = vsub.s32 6, %v1967_v45 }
 0x690   :  { %v537_v3 = vsel %vm529_vm4, %v525_v21, %v535_v23 }
 0x691   :  { %v538_v25 = vpack.c.bf16 %v537_v3, %v536_v24  ;;  %v669_v24 = vrot.slane %v1973_v49, %v668_v26 }
 0x693   :  { %1476 = vmatmul.mubr.bf16.vlgmr.msra.gmra.mrb[8].mxu0 %v538_v25 }
 0x766   :  { %v625_v29 = vpop.f32.mrb[8].mxu0 }
 0x767   :  { %v626_v30 = vadd.f32 %v625_v29, %v542_v28  ;;  %v1477_v31 = vpop.f32.mrb[9].mxu0 }
 0x768   :  { %v628_v32 = vpop.f32.mrb[10].mxu0 }
 0x769   :  { %v629_v35 = vadd.f32 %v628_v32, %v542_v28  ;;  %v1478_v37 = vpop.f32.mrb[11].mxu0  ;;  %v632_v38 = vadd.f32 %v626_v30, %v465_v60  ;;  %v1558_v60 = vld [vmem:[%s2203_s3 + $0x18] sm:$0xff]  }
 0x76a   :  { %1482 = vmatpush3.bf16.msra.mxu1 %v1558_v60 }
 0x76b   :  { %v634_v39 = vsel %vm98_vm1, %v632_v38, 0.0  ;;  %v633_v40 = vadd.f32 %v629_v35, %v466_v62 }
 0x76c   :  { %635 = vadd.xlane.f32.xlu1 %v634_v39 }
 0x76d   :  { %v637_v27 = vsel %vm98_vm1, %v633_v40, 0.0 }
 0x770   :  { %638 = vadd.xlane.f32.xlu1 %v637_v27 }
 0x7f9   :  { %v636_v41 = vpop.xlane.xlu1 %635 }
 0x7fa   :  { %v640_v42 = vmul.f32 0.03125, %v636_v41 }
 0x7fc   :  { %v642_v43 = vsub.f32 %v632_v38, %v640_v42 }
 0x7fd   :  { %v639_v50 = vpop.xlane.xlu1 %638 }
 0x7fe   :  { %v641_v47 = vmul.f32 0.03125, %v639_v50  ;;  %v644_v52 = vmul.f32 %v642_v43, %v642_v43 }
 0x800   :  { %v643_v53 = vsub.f32 %v633_v40, %v641_v47  ;;  %v646_v54 = vsel %vm98_vm1, %v644_v52, 0.0 }
 0x801   :  { %647 = vadd.xlane.f32.xlu0 %v646_v54 }
 0x802   :  { %v645_v56 = vmul.f32 %v643_v53, %v643_v53 }
 0x804   :  { %v649_v57 = vsel %vm98_vm1, %v645_v56, 0.0 }
 0x805   :  { %650 = vadd.xlane.f32.xlu1 %v649_v57 }
 0x88e   :  { %v648_v62 = vpop.xlane.xlu0 %647 }
 0x88f   :  { %v652_v63 = vmul.f32 0.03125, %v648_v62 }
 0x891   :  { %v654_v1 = vadd.f32 1e-05, %v652_v63 }
 0x892   :  { %v651_v2 = vpop.xlane.xlu1 %650 }
 0x893   :  { %1605 = vrsqrt.f32 %v654_v1  ;;  %v653_v15 = vmul.f32 0.03125, %v651_v2 }
 0x895   :  { %v655_v16 = vadd.f32 1e-05, %v653_v15 }
 0x897   :  { %1607 = vrsqrt.f32 %v655_v16 }
 0x89d   :  { %v1606_v18 = vpop.eup %1605 }
 0x89e   :  { %v658_v20 = vmul.f32 %v1606_v18, %v642_v43 }
 0x8a0   :  { %v664_v22 = vmul.f32 %v663_v19, %v658_v20 }
 0x8a1   :  { %v1608_v21 = vpop.eup %1607 }
 0x8a2   :  { %v659_v23 = vmul.f32 %v1608_v21, %v643_v53  ;;  %v2023_v25 = vadd.f32 %v669_v24, %v664_v22 }
 0x8a4   :  { %v665_v3 = vmul.f32 %v663_v19, %v659_v23 }
 0x8a6   :  { %v2025_v28 = vadd.f32 %v669_v24, %v665_v3 }
 0x8a8   :  { %v701_v29 = vpack.c.bf16 %v2025_v28, %v2023_v25 }
 0x8aa   :  { %1484 = vmatmul.mubr.msk.bf16.vlgmr.msra.gmra.mrb[16].mxu1 %vm98_vm1, %v701_v29 }
 0x97d   :  { %v751_v30 = vpop.f32.mrb[16].mxu1 }
 0x97e   :  { %v1485_v31 = vpop.f32.mrb[17].mxu1  ;;  %v758_v32 = vmul.f32 %v751_v30, %v1786_v6  ;;  %v760_v35 = vmul.f32 %v751_v30, %v1791_v7  ;;  %v762_v37 = vmul.f32 %v751_v30, %v1796_v8  ;;  %v764_v49 = vmul.f32 %v751_v30, %v1801_v9 }
 0x97f   :  { %v754_v38 = vpop.f32.mrb[18].mxu1 }
 0x980   :  { %v759_v39 = vmul.f32 %v754_v38, %v1806_v10  ;;  %v761_v40 = vmul.f32 %v754_v38, %v1811_v12  ;;  %v763_v27 = vmul.f32 %v754_v38, %v1816_v13  ;;  %v765_v41 = vmul.f32 %v754_v38, %v1821_v14  ;;  %v1486_v42 = vpop.f32.mrb[19].mxu1 }
 0x981   :  { %v2038_v43 = vpack.c.bf16 %v754_v38, %v751_v30 }
 0x982   :  { %v767_v50 = vpack.c.bf16 %v761_v40, %v760_v35  ;;  %v766_v6 = vpack.c.bf16 %v759_v39, %v758_v32  ;;  %v768_v47 = vpack.c.bf16 %v763_v27, %v762_v37  ;;  %v769_v52 = vpack.c.bf16 %v765_v41, %v764_v49 }
 0x983   :  { %772 = vrot.lane.b32.xlu1 %v2038_v43, %s1708_s13 }
 0x984   :  { %1489 = vmatprep.mubr.msk.bf16.mxu1 %vm98_vm1, %v766_v6 }
 0x9f5   :  { %v773_v8 = vpop.permute.xlu1 %772 }
 0x9f6   :  { %v787_v9 = vsel %vm98_vm1, %v773_v8, 0  ;;  %1536 = vmatprep.subr.msk.bf16.mxu1 %vm98_vm1, %v773_v8 }
 0x9f7   :  { %1488 = vmatpush3.bf16.xpose.msra.mxu1 %v787_v9 }
 0x9f8   :  { %1507 = vmatprep.subr.bf16.mxu1 %v1706_v0 }
 0x9fe   :  { %1490 = vmatmul.mubr.msk.bf16.vlgmr.msra.gmra.mrb[20].mxu1 %vm98_vm1, %v767_v50 }
 0x9ff   :  { %1493 = vmatprep.mubr.msk.bf16.mxu1 %vm98_vm1, %v768_v47 }
 0xa06   :  { %1494 = vmatmul.mubr.msk.bf16.gmra.mrb[24].mxu1 %vm98_vm1, %v769_v52 }
 0xa07   :  { %1511 = vmatprep.mubr.msk.bf16.mxu1 %vm1707_vm0, %v1706_v0 }
 0xad1   :  { %v1491_v10 = vpop.f32.mrb[20].mxu1 }
 0xad2   :  { %v832_v13 = vadd.f32 %v1491_v10, %v1847_v33  ;;  %v823_v14 = vpop.f32.mrb[21].mxu1 }
 0xad3   :  { %v824_v53 = vadd.f32 %v823_v14, %v1852_v34  ;;  %v1492_v54 = vpop.f32.mrb[22].mxu1 }
 0xad4   :  { %v835_v56 = vadd.f32 %v1492_v54, %v1857_v36  ;;  %v826_v57 = vpop.f32.mrb[23].mxu1  ;;  %v860_v59 = vsel %vm239_vm2, %v832_v13, -inf }
 0xad5   :  { %861 = vmax.xlane.f32.xlu0 %v860_v59  ;;  %v854_v60 = vsel %vm239_vm2, %v824_v53, -inf  ;;  %v827_v62 = vadd.f32 %v826_v57, %v1866_v44 }
 0xad6   :  { %855 = vmax.xlane.f32.xlu1 %v854_v60  ;;  %v863_v63 = vsel %vm239_vm2, %v835_v56, -inf }
 0xad7   :  { %v857_v36 = vsel %vm239_vm2, %v827_v62, -inf }
 0xad9   :  { %864 = vmax.xlane.f32.xlu0 %v863_v63  ;;  %v1495_v1 = vpop.f32.mrb[24].mxu1 }
 0xada   :  { %v839_v33 = vpop.f32.mrb[25].mxu1  ;;  %v848_v34 = vadd.f32 %v1495_v1, %v1874_v48 }
 0xadb   :  { %v1496_v2 = vpop.f32.mrb[26].mxu1  ;;  %v840_v16 = vadd.f32 %v839_v33, %v1881_v55 }
 0xadc   :  { %v842_v15 = vpop.f32.mrb[27].mxu1  ;;  %v872_v18 = vsel %vm239_vm2, %v848_v34, -inf  ;;  %v851_v20 = vadd.f32 %v1496_v2, %v1895_v61 }
 0xadd   :  { %858 = vmax.xlane.f32.xlu0 %v857_v36  ;;  %v843_v19 = vadd.f32 %v842_v15, %v1888_v58  ;;  %v866_v44 = vsel %vm239_vm2, %v840_v16, -inf }
 0xade   :  { %v875_v48 = vsel %vm239_vm2, %v851_v20, -inf }
 0xadf   :  { %v869_v21 = vsel %vm239_vm2, %v843_v19, -inf }
 0xae1   :  { %873 = vmax.xlane.f32.xlu0 %v872_v18 }
 0xae5   :  { %867 = vmax.xlane.f32.xlu0 %v866_v44 }
 0xae9   :  { %870 = vmax.xlane.f32.xlu0 %v869_v21 }
 0xaed   :  { %876 = vmax.xlane.f32.xlu0 %v875_v48 }
 0xb62   :  { %v862_v22 = vpop.xlane.xlu0 %861 }
 0xb63   :  { %v880_v23 = vsub.f32 %v832_v13, %v862_v22  ;;  %v856_v24 = vpop.xlane.xlu1 %855 }
 0xb64   :  { %v878_v55 = vsub.f32 %v824_v53, %v856_v24 }
 0xb65   :  { %v890_v3 = vmul.f32 1.442695, %v880_v23 }
 0xb66   :  { %v886_v29 = vmul.f32 1.442695, %v878_v55  ;;  %v865_v30 = vpop.xlane.xlu0 %864 }
 0xb67   :  { %1609 = vpow2.f32 %v890_v3  ;;  %v881_v58 = vsub.f32 %v835_v56, %v865_v30 }
 0xb68   :  { %1611 = vpow2.f32 %v886_v29 }
 0xb69   :  { %v892_v35 = vmul.f32 1.442695, %v881_v58 }
 0xb6a   :  { %v859_v31 = vpop.xlane.xlu0 %858 }
 0xb6b   :  { %v879_v32 = vsub.f32 %v827_v62, %v859_v31 }
 0xb6d   :  { %v888_v61 = vmul.f32 1.442695, %v879_v32 }
 0xb6e   :  { %v874_v37 = vpop.xlane.xlu0 %873 }
 0xb6f   :  { %1613 = vpow2.f32 %v888_v61  ;;  %v884_v49 = vsub.f32 %v848_v34, %v874_v37 }
 0xb70   :  { %1615 = vpow2.f32 %v892_v35 }
 0xb71   :  { %v2067_v38 = vpop.eup %1609  ;;  %v898_v39 = vmul.f32 1.442695, %v884_v49 }
 0xb72   :  { %v868_v40 = vpop.xlane.xlu0 %867  ;;  %v908_v27 = vsel %vm239_vm2, %v2067_v38, 0.0  ;;  %v1612_v41 = vpop.eup %1611 }
 0xb73   :  { %1617 = vpow2.f32 %v898_v39  ;;  %v882_v42 = vsub.f32 %v840_v16, %v868_v40  ;;  %909 = vadd.xlane.f32.xlu0 %v908_v27  ;;  %v902_v47 = vsel %vm239_vm2, %v1612_v41, 0.0 }
 0xb75   :  { %v894_v50 = vmul.f32 1.442695, %v882_v42 }
 0xb76   :  { %v871_v6 = vpop.xlane.xlu0 %870 }
 0xb77   :  { %1619 = vpow2.f32 %v894_v50  ;;  %v883_v52 = vsub.f32 %v843_v19, %v871_v6  ;;  %903 = vadd.xlane.f32.xlu0 %v902_v47  ;;  %v1649_v6 = vld [vmem:[%s2202_s2] sm:$0xff] }
 0xb79   :  { %v1614_v8 = vpop.eup %1613  ;;  %v896_v9 = vmul.f32 1.442695, %v883_v52 }
 0xb7a   :  { %v877_v10 = vpop.xlane.xlu0 %876  ;;  %v905_v13 = vsel %vm239_vm2, %v1614_v8, 0.0  ;;  %v1616_v14 = vpop.eup %1615 }
 0xb7b   :  { %1621 = vpow2.f32 %v896_v9  ;;  %v885_v53 = vsub.f32 %v851_v20, %v877_v10  ;;  %906 = vadd.xlane.f32.xlu1 %v905_v13  ;;  %v911_v57 = vsel %vm239_vm2, %v1616_v14, 0.0  ;;  %v1650_v13 = vld [vmem:[%s2202_s2 + $0x8] sm:$0xff] }
 0xb7d   :  { %v1618_v54 = vpop.eup %1617  ;;  %v900_v56 = vmul.f32 1.442695, %v885_v53 }
 0xb7e   :  { %v920_v59 = vsel %vm239_vm2, %v1618_v54, 0.0 }
 0xb7f   :  { %1623 = vpow2.f32 %v900_v56  ;;  %912 = vadd.xlane.f32.xlu1 %v911_v57  ;;  %921 = vadd.xlane.f32.xlu0 %v920_v59 }
 0xb81   :  { %v1620_v60 = vpop.eup %1619 }
 0xb82   :  { %v914_v62 = vsel %vm239_vm2, %v1620_v60, 0.0 }
 0xb83   :  { %915 = vadd.xlane.f32.xlu0 %v914_v62 }
 0xb85   :  { %v1622_v63 = vpop.eup %1621 }
 0xb86   :  { %v917_v1 = vsel %vm239_vm2, %v1622_v63, 0.0 }
 0xb87   :  { %918 = vadd.xlane.f32.xlu1 %v917_v1  ;;  %v1653_v1 = vld [vmem:[%s2202_s2 + $0x28] sm:$0xff] }
 0xb89   :  { %v1624_v33 = vpop.eup %1623 }
 0xb8a   :  { %v923_v2 = vsel %vm239_vm2, %v1624_v33, 0.0 }
 0xb8b   :  { %924 = vadd.xlane.f32.xlu1 %v923_v2  ;;  %v1654_v2 = vld [vmem:[%s2202_s2 + $0x38] sm:$0xff] }
 0xb99   :  { %946 = vrot.lane.b32.xlu0 %v2038_v43, %s1709_s1 }
 0xc00   :  { %v910_v34 = vpop.xlane.xlu0 %909 }
 0xc04   :  { %v904_v15 = vpop.xlane.xlu0 %903 }
 0xc05   :  { %1625 = vrcp.f32 %v904_v15 }
 0xc08   :  { %v907_v36 = vpop.xlane.xlu1 %906 }
 0xc09   :  { %1627 = vrcp.f32 %v907_v36 }
 0xc0a   :  { %1629 = vrcp.f32 %v910_v34 }
 0xc0c   :  { %v922_v16 = vpop.xlane.xlu0 %921  ;;  %v913_v18 = vpop.xlane.xlu1 %912 }
 0xc0d   :  { %1631 = vrcp.f32 %v913_v18 }
 0xc0f   :  { %v1626_v44 = vpop.eup %1625 }
 0xc10   :  { %v916_v19 = vpop.xlane.xlu0 %915  ;;  %v934_v22 = vmul.f32 %v1626_v44, %v1612_v41 }
 0xc11   :  { %1633 = vrcp.f32 %v916_v19 }
 0xc13   :  { %v1628_v20 = vpop.eup %1627 }
 0xc14   :  { %v947_v21 = vpop.permute.xlu0 %946  ;;  %v919_v48 = vpop.xlane.xlu1 %918  ;;  %v935_v23 = vmul.f32 %v1628_v20, %v1614_v8 }
 0xc15   :  { %1635 = vrcp.f32 %v919_v48  ;;  %1497 = vmatprep.subr.bf16.mxu0 %v947_v21  ;;  %v1630_v43 = vpop.eup %1629 }
 0xc16   :  { %1498 = vmatpush3.bf16.msra.mxu0 %v947_v21  ;;  %v942_v24 = vpack.c.bf16 %v935_v23, %v934_v22  ;;  %1637 = vrcp.f32 %v922_v16  ;;  %v936_v29 = vmul.f32 %v1630_v43, %v2067_v38 }
 0xc17   :  { %1515 = vmatprep.subr.bf16.mxu0 %v1706_v0  ;;  %v1632_v55 = vpop.eup %1631 }
 0xc18   :  { %1499 = vmatprep.mubr.msk.bf16.mxu0 %vm239_vm2, %v942_v24  ;;  %v925_v3 = vpop.xlane.xlu1 %924  ;;  %v937_v30 = vmul.f32 %v1632_v55, %v1616_v14 }
 0xc19   :  { %1639 = vrcp.f32 %v925_v3 }
 0xc1a   :  { %v943_v58 = vpack.c.bf16 %v937_v30, %v936_v29  ;;  %v1560_v30 = vld [vmem:[%s2204_s4 + $0x18] sm:$0xff]  }
 0xc1b   :  { %v1634_v31 = vpop.eup %1633 }
 0xc1c   :  { %1500 = vmatmul.mubr.msk.bf16.vlgmr.msra.gmra.mrb[12].mxu0 %vm239_vm2, %v943_v58  ;;  %v938_v35 = vmul.f32 %v1634_v31, %v1620_v60  ;;  %v1561_v58 = vld [vmem:[%s2205_s5 + $0x40] sm:$0xff]   ;;  %v1562_v31 = vld [vmem:[%s2205_s5 + $0x48] sm:$0xff]  }
 0xc1d   :  { %1516 = vmatpush3.bf16.msra.mxu0 %v1561_v58 }
 0xc1e   :  { %1517 = vmatprep.subr.bf16.mxu0 %v1706_v0 }
 0xc1f   :  { %v1636_v32 = vpop.eup %1635 }
 0xc20   :  { %v939_v61 = vmul.f32 %v1636_v32, %v1622_v63  ;;  %v1638_v37 = vpop.eup %1637  ;;  %v1563_v32 = vld [vmem:[%s2205_s5 + $0x50] sm:$0xff]  }
 0xc21   :  { %v940_v40 = vmul.f32 %v1638_v37, %v1618_v54  ;;  %1518 = vmatpush3.bf16.msra.mxu0 %v1562_v31  ;;  %v1566_v37 = vld [vmem:[%s2205_s5 + $0x68] sm:$0xff]  }
 0xc22   :  { %v944_v49 = vpack.c.bf16 %v939_v61, %v938_v35  ;;  %1519 = vmatprep.subr.bf16.mxu0 %v1706_v0  ;;  %v1564_v35 = vld [vmem:[%s2205_s5 + $0x58] sm:$0xff]   ;;  %v1565_v61 = vld [vmem:[%s2205_s5 + $0x60] sm:$0xff]  }
 0xc23   :  { %v1640_v39 = vpop.eup %1639 }
 0xc24   :  { %1503 = vmatprep.mubr.msk.bf16.mxu0 %vm239_vm2, %v944_v49  ;;  %v941_v27 = vmul.f32 %v1640_v39, %v1624_v33 }
 0xc25   :  { %1520 = vmatpush3.bf16.msra.mxu0 %v1563_v32 }
 0xc26   :  { %v945_v41 = vpack.c.bf16 %v941_v27, %v940_v40  ;;  %1521 = vmatprep.subr.bf16.mxu0 %v1706_v0 }
 0xc28   :  { %1504 = vmatmul.mubr.msk.bf16.gmra.mrb[16].mxu0 %vm239_vm2, %v945_v41 }
 0xc29   :  { %1531 = vmatprep.mubr.msk.bf16.mxu0 %vm1707_vm0, %v1706_v0  ;;  %1522 = vmatpush3.bf16.msra.mxu0 %v1564_v35 }
 0xc2a   :  { %1523 = vmatprep.subr.bf16.mxu0 %v1706_v0 }
 0xc2d   :  { %1524 = vmatpush3.bf16.msra.mxu0 %v1565_v61 }
 0xc2e   :  { %1525 = vmatprep.subr.bf16.mxu0 %v1706_v0 }
 0xc31   :  { %1526 = vmatpush3.bf16.msra.mxu0 %v1566_v37 }
 0xc32   :  { %1527 = vmatprep.subr.bf16.mxu0 %v1706_v0 }
 0xcef   :  { %v1501_v38 = vpop.f32.mrb[12].mxu0 }
 0xcf0   :  { %v1028_v42 = vmul.f32 %v1501_v38, %v1791_v7  ;;  %v995_v50 = vpop.f32.mrb[13].mxu0  ;;  %v1651_v7 = vld [vmem:[%s2202_s2 + $0x20] sm:$0xff] }
 0xcf1   :  { %v1026_v47 = vmul.f32 %v1649_v6, %v995_v50  ;;  %v1502_v52 = vpop.f32.mrb[14].mxu0 }
 0xcf2   :  { %v1029_v8 = vmul.f32 %v1502_v52, %v1811_v12  ;;  %v998_v9 = vpop.f32.mrb[15].mxu0  ;;  %v1652_v12 = vld [vmem:[%s2202_s2 + $0x30] sm:$0xff] }
 0xcf3   :  { %v1034_v10 = vadd.f32 %v1028_v42, %v1026_v47  ;;  %v1027_v14 = vmul.f32 %v1650_v13, %v998_v9  ;;  %v2148_v42 = vld [vmem:[%s2206_s6 + $0x8] sm:$0xff] }
 0xcf4   :  { %v1071_v6 = vrot.slane %v2148_v42, %v457_v46  ;;  %v1568_v46 = vld [vmem:[%s2205_s5 + $0x78] sm:$0xff]   ;;  %v1276_v37 = vrot.slane %v2148_v42, %v662_v17 }
 0xcf5   :  { %v1035_v53 = vadd.f32 %v1029_v8, %v1027_v14  ;;  %v1077_v8 = vrot.slane %v2148_v42, %v463_v51  ;;  %v1084_v51 = vrot.slane %v2148_v42, %v470_v5  ;;  %v1155_v5 = vrot.slane %v2148_v42, %v541_v4 }
 0xcfb   :  { %v1505_v54 = vpop.f32.mrb[16].mxu0 }
 0xcfc   :  { %v1011_v56 = vpop.f32.mrb[17].mxu0  ;;  %v1032_v62 = vmul.f32 %v1652_v12, %v1505_v54 }
 0xcfd   :  { %v1030_v57 = vmul.f32 %v1651_v7, %v1011_v56  ;;  %v1506_v59 = vpop.f32.mrb[18].mxu0  ;;  %v1567_v56 = vld [vmem:[%s2205_s5 + $0x70] sm:$0xff]   ;;  %v1146_v7 = vrot.slane %v2148_v42, %v532_v11  ;;  %s1710_s5 = smov [#allocation5]  }
 0xcfe   :  { %v1014_v60 = vpop.f32.mrb[19].mxu0  ;;  %v1033_v34 = vmul.f32 %v1654_v2, %v1506_v59  ;;  %1528 = vmatpush3.bf16.msra.mxu0 %v1567_v56  ;;  %s1292_s18 = sshll.u32 %s1710_s5, 4  ;;  %s1293_s18 = int_to_ptr.vmem [resolvable:$true] %s1292_s18 }
 0xcff   :  { %v1036_v63 = vadd.f32 %v1034_v10, %v1030_v57  ;;  %v1031_v33 = vmul.f32 %v1653_v1, %v1014_v60  ;;  %1529 = vmatprep.subr.bf16.mxu0 %v1706_v0  ;;  %s1677_s0 = scalar_lea.vmem %s1293_s18, 256  ;;  %p1682_p9 = scmp.lt.s32.totalorder %s1293_s18, %s1293_s18 }
 0xd00   :  { %p1678_p8 = scmp.ne.s32.totalorder %s1293_s18, %s1677_s0  ;;  %p1683_p10 = scmp.lt.s32.totalorder %s1677_s0, %s1677_s0 }
 0xd01   :  { %v1037_v15 = vadd.f32 %v1035_v53, %v1031_v33  ;;  %v1038_v36 = vadd.f32 %v1036_v63, %v1032_v62 }
 0xd02   :  { %1530 = vmatpush3.bf16.msra.mxu0 %v1568_v46  ;;  %p1684_p11 = por %p1683_p10, %p1682_p9 }
 0xd03   :  { %v1040_v16 = vadd.f32 %v1038_v36, %v2023_v25  ;;  %v1039_v18 = vadd.f32 %v1037_v15, %v1033_v34 }
 0xd04   :  { %p1685_p12 = pnand %p1684_p11, %p1678_p8 }
 0xd05   :  { %v1042_v19 = vsel %vm98_vm1, %v1040_v16, 0.0  ;;  %v1041_v44 = vadd.f32 %v1039_v18, %v2025_v28  ;;  %v1559_v28 = vld [vmem:[%s2204_s4 + $0x10] sm:$0xff]  }
 0xd06   :  { %1043 = vadd.xlane.f32.xlu1 %v1042_v19  ;;  %1508 = vmatpush3.bf16.msra.mxu1 %v1559_v28 }
 0xd07   :  { %v1045_v20 = vsel %vm98_vm1, %v1041_v44, 0.0  ;;  %1509 = vmatprep.subr.bf16.mxu1 %v1706_v0 }
 0xd0a   :  { %1046 = vadd.xlane.f32.xlu1 %v1045_v20  ;;  %1510 = vmatpush3.bf16.msra.mxu1 %v1560_v30 }
 0xd93   :  { %v1044_v21 = vpop.xlane.xlu1 %1043 }
 0xd94   :  { %v1048_v48 = vmul.f32 0.03125, %v1044_v21 }
 0xd96   :  { %v1050_v22 = vsub.f32 %v1040_v16, %v1048_v48 }
 0xd97   :  { %v1047_v23 = vpop.xlane.xlu1 %1046 }
 0xd98   :  { %v1049_v43 = vmul.f32 0.03125, %v1047_v23  ;;  %v1052_v24 = vmul.f32 %v1050_v22, %v1050_v22 }
 0xd9a   :  { %v1051_v55 = vsub.f32 %v1041_v44, %v1049_v43  ;;  %v1054_v3 = vsel %vm98_vm1, %v1052_v24, 0.0 }
 0xd9b   :  { %1055 = vadd.xlane.f32.xlu1 %v1054_v3 }
 0xd9c   :  { %v1053_v25 = vmul.f32 %v1051_v55, %v1051_v55 }
 0xd9e   :  { %v1057_v29 = vsel %vm98_vm1, %v1053_v25, 0.0 }
 0xd9f   :  { %1058 = vadd.xlane.f32.xlu1 %v1057_v29 }
 0xe28   :  { %v1056_v49 = vpop.xlane.xlu1 %1055 }
 0xe29   :  { %v1060_v39 = vmul.f32 0.03125, %v1056_v49 }
 0xe2b   :  { %v1062_v40 = vadd.f32 1e-05, %v1060_v39 }
 0xe2c   :  { %v1059_v27 = vpop.xlane.xlu1 %1058 }
 0xe2d   :  { %1641 = vrsqrt.f32 %v1062_v40  ;;  %v1061_v41 = vmul.f32 0.03125, %v1059_v27  ;;  %v1282_v40 = vrot.slane %v2148_v42, %v668_v26 }
 0xe2f   :  { %v1063_v38 = vadd.f32 1e-05, %v1061_v41 }
 0xe31   :  { %1643 = vrsqrt.f32 %v1063_v38 }
 0xe37   :  { %v1642_v50 = vpop.eup %1641 }
 0xe38   :  { %v1066_v47 = vmul.f32 %v1642_v50, %v1050_v22 }
 0xe3a   :  { %v1072_v9 = vmul.f32 %v1071_v6, %v1066_v47 }
 0xe3b   :  { %v1644_v52 = vpop.eup %1643 }
 0xe3c   :  { %v1067_v10 = vmul.f32 %v1644_v52, %v1051_v55  ;;  %v1078_v14 = vadd.f32 %v1077_v8, %v1072_v9 }
 0xe3e   :  { %v1073_v13 = vmul.f32 %v1071_v6, %v1067_v10 }
 0xe40   :  { %v1079_v53 = vadd.f32 %v1077_v8, %v1073_v13 }
 0xe42   :  { %v1080_v54 = vpack.c.bf16 %v1079_v53, %v1078_v14 }
 0xe44   :  { %1512 = vmatmul.mubr.msk.bf16.vlgmr.msra.gmra.mrb[28].mxu1 %vm98_vm1, %v1080_v54 }
 0xf17   :  { %v1134_v57 = vpop.f32.mrb[28].mxu1 }
 0xf18   :  { %v1135_v59 = vadd.f32 %v1134_v57, %v1084_v51  ;;  %v1513_v60 = vpop.f32.mrb[29].mxu1 }
 0xf19   :  { %v1137_v12 = vpop.f32.mrb[30].mxu1 }
 0xf1a   :  { %v1147_v62 = vmul.f32 %v1146_v7, %v1135_v59  ;;  %v1138_v63 = vadd.f32 %v1137_v12, %v1084_v51  ;;  %v1514_v0 = vpop.f32.mrb[31].mxu1  ;;  %vm1141_vm5 = vcmp.gt.f32.partialorder %v1135_v59, 0.0 }
 0xf1c   :  { %vm1142_vm6 = vcmp.gt.f32.partialorder %v1138_v63, 0.0  ;;  %v1148_v1 = vmul.f32 %v1146_v7, %v1138_v63  ;;  %v1149_v33 = vsel %vm1141_vm5, %v1135_v59, %v1147_v62 }
 0xf1e   :  { %v1150_v2 = vsel %vm1142_vm6, %v1138_v63, %v1148_v1 }
 0xf1f   :  { %v1151_v34 = vpack.c.bf16 %v1150_v2, %v1149_v33 }
 0xf21   :  { %1532 = vmatmul.mubr.bf16.vlgmr.msra.gmra.mrb[20].mxu0 %v1151_v34 }
 0xff4   :  { %v1238_v15 = vpop.f32.mrb[20].mxu0 }
 0xff5   :  { %v1239_v11 = vadd.f32 %v1238_v15, %v1155_v5  ;;  %v1533_v36 = vpop.f32.mrb[21].mxu0 }
 0xff6   :  { %v1241_v16 = vpop.f32.mrb[22].mxu0 }
 0xff7   :  { %v1242_v18 = vadd.f32 %v1241_v16, %v1155_v5  ;;  %v1534_v19 = vpop.f32.mrb[23].mxu0  ;;  %v1245_v44 = vadd.f32 %v1239_v11, %v1078_v14 }
 0xff9   :  { %v1247_v20 = vsel %vm98_vm1, %v1245_v44, 0.0  ;;  %v1246_v21 = vadd.f32 %v1242_v18, %v1079_v53 }
 0xffa   :  { %1248 = vadd.xlane.f32.xlu1 %v1247_v20 }
 0xffb   :  { %v1250_v48 = vsel %vm98_vm1, %v1246_v21, 0.0 }
 0xffe   :  { %1251 = vadd.xlane.f32.xlu1 %v1250_v48 }
0x1087   :  { %v1249_v22 = vpop.xlane.xlu1 %1248 }
0x1088   :  { %v1253_v23 = vmul.f32 0.03125, %v1249_v22 }
0x108a   :  { %v1255_v43 = vsub.f32 %v1245_v44, %v1253_v23 }
0x108b   :  { %v1252_v24 = vpop.xlane.xlu1 %1251 }
0x108c   :  { %v1254_v55 = vmul.f32 0.03125, %v1252_v24  ;;  %v1257_v4 = vmul.f32 %v1255_v43, %v1255_v43 }
0x108e   :  { %v1256_v3 = vsub.f32 %v1246_v21, %v1254_v55  ;;  %v1259_v25 = vsel %vm98_vm1, %v1257_v4, 0.0 }
0x108f   :  { %1260 = vadd.xlane.f32.xlu0 %v1259_v25 }
0x1090   :  { %v1258_v29 = vmul.f32 %v1256_v3, %v1256_v3 }
0x1092   :  { %v1262_v28 = vsel %vm98_vm1, %v1258_v29, 0.0 }
0x1093   :  { %1263 = vadd.xlane.f32.xlu1 %v1262_v28 }
0x111c   :  { %v1261_v30 = vpop.xlane.xlu0 %1260 }
0x111d   :  { %v1265_v58 = vmul.f32 0.03125, %v1261_v30 }
0x111f   :  { %v1267_v31 = vadd.f32 1e-05, %v1265_v58 }
0x1120   :  { %v1264_v32 = vpop.xlane.xlu1 %1263 }
0x1121   :  { %1645 = vrsqrt.f32 %v1267_v31  ;;  %v1266_v35 = vmul.f32 0.03125, %v1264_v32 }
0x1123   :  { %v1268_v61 = vadd.f32 1e-05, %v1266_v35 }
0x1125   :  { %1647 = vrsqrt.f32 %v1268_v61 }
0x112b   :  { %v1646_v49 = vpop.eup %1645 }
0x112c   :  { %v1271_v39 = vmul.f32 %v1646_v49, %v1255_v43 }
0x112e   :  { %v1277_v27 = vmul.f32 %v1276_v37, %v1271_v39 }
0x112f   :  { %v1648_v41 = vpop.eup %1647 }
0x1130   :  { %v1272_v38 = vmul.f32 %v1648_v41, %v1256_v3  ;;  %v1283_v50 = vadd.f32 %v1282_v40, %v1277_v27 }
0x1132   :  { %v1278_v6 = vmul.f32 %v1276_v37, %v1272_v38  ;;  %1285 = vst.msk [vmem:[#allocation5] sm:$0xff] %vm98_vm1, %v1283_v50 }
0x1134   :  { %v1284_v47 = vadd.f32 %v1282_v40, %v1278_v6 }
0x1136   :  { %1286 = vst.msk [vmem:[#allocation5 + $0x8] sm:$0xff] %vm98_vm1, %v1284_v47 }
0x1137   :  { %1688 = shalt.err (!%p1685_p12)
}
0x1138   :  { %s1689_s21 = scalar_lea.hbm %s2207_s7, 256 }
0x1139   :  { %p1690_p13 = scmp.ne.s32.totalorder %s2207_s7, %s1689_s21  ;;  %p1693_p0 = scmp.lt.u32.totalorder %s1689_s21, %s2207_s7 }
0x113b   :  { %p1695_p1 = pnand %p1693_p0, %p1690_p13 }
0x113d   :  { %1698 = shalt.err (!%p1695_p1)
}
0x113e   :  { %1298 = dma.vmem_to_hbm [thread:$0]  %s1293_s18, 256, %s2207_s7, [#allocation4], %s1704_s11, %s1704_s11, %s1705_s12  }
0x113f   :  { %1701 = dma.done.wait [#allocation4], 256  }
0x1140   :  { %1702 = vsyncadd [#allocation4], 4294967040 }
0x1141   :  { %1302 = vsyncpa [#allocation3], 1 }
0x1142   :  { %1303 = vsyncpa [#allocation4], 1 }

</bundles_post_ra>
